<compile_context>
chip_gen: v6e
topology: v6e:2x2x1
jax: 0.10.0
libtpu: 0.0.40
codegen_flags: <defaults>
</compile_context>

<pallas_src>
import jax
import jax.numpy as jnp
import numpy as np
from jax import lax
from jax.experimental import pallas as pl
from jax.experimental.pallas import tpu as pltpu


def _lstm_kernel(x_ref, w_ih_ref, w_hh_ref, b_ref, w_out_ref, b_out_ref,
                 y_ref, xwb_ref, h_all_ref, h_ref, c_ref):
    """One (batch-tile, time-chunk) grid cell of the LSTM + Linear(50->1).

    x_ref     : (Tc, Bt, 1)     time-major input chunk
    w_ih_ref  : (1, 4*Hp)  f32  fused input->hidden weights, gate order (i,f,o,g)
    w_hh_ref  : (Hp, 4*Hp) bf16 fused hidden->hidden weights (same gate order)
    b_ref     : (1, 4*Hp)  f32  b_ih + b_hh in fused layout
    w_out_ref : (1, Hp)    f32  Linear(50,1) weight, hidden padded to Hp
    b_out_ref : (1,)            Linear bias (SMEM scalar)
    y_ref     : (Tc, Bt)        output chunk
    xwb_ref   : (Tc, Bt, 4*Hp)  scratch: hoisted x*W_ih + b for this chunk
    h_all_ref : (Tc, Bt, Hp)    scratch: hidden state of every step in chunk
    h_ref/c_ref : (Bt, Hp)      persistent recurrent state across time chunks
    """
    t_chunk = pl.program_id(1)
    Tc = x_ref.shape[0]
    Hp = w_hh_ref.shape[0]

    # Reset the recurrent state at the start of each batch tile's sequence.
    @pl.when(t_chunk == 0)
    def _():
        h_ref[...] = jnp.zeros_like(h_ref)
        c_ref[...] = jnp.zeros_like(c_ref)

    # Hoisted off the serial critical path (per chunk, bounded VMEM):
    #   (Tc, Bt, 1) * (1, 4Hp) + (1, 4Hp) -> (Tc, Bt, 4Hp)
    xwb_ref[...] = x_ref[...] * w_ih_ref[...] + b_ref[...]

    def step(t, carry):
        h = h_ref[...]
        c = c_ref[...]
        # Fused gate matmul on the MXU: (Bt, Hp) @ (Hp, 4*Hp), bf16 inputs,
        # f32 accumulation.  w_hh is streamed from VMEM every step instead of
        # being pinned in vregs across the loop.
        pre = xwb_ref[t] + jnp.dot(
            h.astype(jnp.bfloat16), w_hh_ref[...],
            preferred_element_type=jnp.float32)
        # Gate layout (i, f, o, g): one sigmoid over the contiguous 3-gate
        # slab, one tanh over the last gate.  All slices are 128-lane views.
        sig = jax.nn.sigmoid(pre[:, :3 * Hp])
        i = sig[:, 0 * Hp:1 * Hp]
        f = sig[:, 1 * Hp:2 * Hp]
        o = sig[:, 2 * Hp:3 * Hp]
        g = jnp.tanh(pre[:, 3 * Hp:])
        c_new = f * c + i * g
        h_new = o * jnp.tanh(c_new)
        h_ref[...] = h_new
        c_ref[...] = c_new
        h_all_ref[t] = h_new
        return carry

    # Fixed unroll (not full unroll): keeps compile time / live ranges bounded
    # while still giving the LLO scheduler a window to hide VPU work.
    lax.fori_loop(0, Tc, step, 0, unroll=8)

    # Batched Linear(H -> 1): one cross-lane reduce over the whole chunk,
    # one store of the chunk's output slab.
    y = jnp.sum(h_all_ref[...] * w_out_ref[...], axis=-1) + b_out_ref[0]
    y_ref[...] = y


def _pack_params(w_ih, w_hh, b_ih, b_hh, w_lin, b_lin, Hp):
    """Repack PyTorch-layout LSTM params into the fused, lane-padded layout."""
    H = w_hh.shape[1]
    w_ih_g = w_ih.reshape(4, H)          # input_size == 1
    w_hh_g = w_hh.reshape(4, H, H)
    b_g = (b_ih + b_hh).reshape(4, H)

    # PyTorch stacks gates as (i, f, g, o); kernel uses (i, f, o, g) so the
    # sigmoid gates are contiguous.  Each gate occupies its own Hp-lane tile.
    order = (0, 1, 3, 2)
    w_ih_p = jnp.zeros((1, 4 * Hp), jnp.float32)
    w_hh_p = jnp.zeros((Hp, 4 * Hp), jnp.float32)
    b_p = jnp.zeros((1, 4 * Hp), jnp.float32)
    for slot, k in enumerate(order):
        col = slot * Hp
        w_ih_p = w_ih_p.at[0, col:col + H].set(w_ih_g[k])
        w_hh_p = w_hh_p.at[:H, col:col + H].set(w_hh_g[k].T)
        b_p = b_p.at[0, col:col + H].set(b_g[k])

    w_out_p = jnp.zeros((1, Hp), jnp.float32).at[0, :H].set(w_lin[0])
    b_out_p = b_lin.reshape((1,)).astype(jnp.float32)
    # Hidden->hidden weights feed the MXU as bf16 (native single-pass input).
    return w_ih_p, w_hh_p.astype(jnp.bfloat16), b_p, w_out_p, b_out_p


def _round_up(n, m):
    return ((n + m - 1) // m) * m


@jax.jit
def lstm_forward(x, w_ih, w_hh, b_ih, b_hh, w_lin, b_lin):
    """Pallas LSTM forward.  x: (B, T, 1) float32 -> (B, T, 1) float32."""
    B, T, _ = x.shape
    H = w_hh.shape[1]
    Hp = _round_up(H, 128)               # hidden padded to full 128-lane tiles

    # Batch tiling: small batches ride in one matmul (MXU rows are nearly free
    # until they fill); large batches split into 128-row tiles on a "parallel"
    # grid axis so v7x's second TensorCore can pick them up.
    if B <= 128:
        Bt = max(8, _round_up(B, 8))
        Bp = Bt
    else:
        Bt = 128
        Bp = _round_up(B, 128)
    nb = Bp // Bt

    # Time chunking: stream x in / y out with double-buffered BlockSpecs and
    # keep VMEM usage independent of T.
    Tc = 128 if T > 128 else _round_up(T, 8)
    Tp = _round_up(T, Tc)
    nt = Tp // Tc

    w_ih_p, w_hh_p, b_p, w_out_p, b_out_p = _pack_params(
        w_ih, w_hh, b_ih, b_hh, w_lin, b_lin, Hp)

    # Time-major, batch/time-padded input.  Padded rows/steps stay zero and
    # are sliced off below (padded time steps trail the real sequence, so
    # they never feed real outputs).
    x_tm = jnp.transpose(x, (1, 0, 2)).astype(jnp.float32)     # (T, B, 1)
    x_p = jnp.zeros((Tp, Bp, 1), jnp.float32).at[:T, :B, :].set(x_tm)

    y_p = pl.pallas_call(
        _lstm_kernel,
        out_shape=jax.ShapeDtypeStruct((Tp, Bp), jnp.float32),
        grid_spec=pltpu.PrefetchScalarGridSpec(
            num_scalar_prefetch=0,
            grid=(nb, nt),
            in_specs=[
                pl.BlockSpec((Tc, Bt, 1), lambda b, t: (t, b, 0)),     # x
                pl.BlockSpec((1, 4 * Hp), lambda b, t: (0, 0)),        # w_ih
                pl.BlockSpec((Hp, 4 * Hp), lambda b, t: (0, 0)),       # w_hh
                pl.BlockSpec((1, 4 * Hp), lambda b, t: (0, 0)),        # bias
                pl.BlockSpec((1, Hp), lambda b, t: (0, 0)),            # w_out
                pl.BlockSpec(memory_space=pltpu.MemorySpace.SMEM),     # b_out
            ],
            out_specs=pl.BlockSpec((Tc, Bt), lambda b, t: (t, b)),
            scratch_shapes=[
                pltpu.VMEM((Tc, Bt, 4 * Hp), jnp.float32),  # x*W_ih + b (chunk)
                pltpu.VMEM((Tc, Bt, Hp), jnp.float32),      # hidden states (chunk)
                pltpu.VMEM((Bt, Hp), jnp.float32),          # h state (persistent)
                pltpu.VMEM((Bt, Hp), jnp.float32),          # c state (persistent)
            ],
        ),
        compiler_params=pltpu.CompilerParams(
            dimension_semantics=("parallel", "arbitrary"),
        ),
    )(x_p, w_ih_p, w_hh_p, b_p, w_out_p, b_out_p)

    # Strip padding, back to batch-first (B, T, 1).
    return jnp.transpose(y_p[:T, :B], (1, 0))[:, :, None]


def lstm_reference(x, w_ih, w_hh, b_ih, b_hh, w_lin, b_lin):
    """Pure-JAX reference matching PyTorch LSTM(batch_first) + Linear."""
    B, T, _ = x.shape
    H = w_hh.shape[1]
    h = jnp.zeros((B, H), jnp.float32)
    c = jnp.zeros((B, H), jnp.float32)
    ys = []
    for t in range(T):
        x_t = x[:, t, :]                                        # (B, 1)
        gates = x_t @ w_ih.T + h @ w_hh.T + b_ih + b_hh         # (B, 4H)
        i = jax.nn.sigmoid(gates[:, 0 * H:1 * H])
        f = jax.nn.sigmoid(gates[:, 1 * H:2 * H])
        g = jnp.tanh(gates[:, 2 * H:3 * H])
        o = jax.nn.sigmoid(gates[:, 3 * H:4 * H])
        c = f * c + i * g
        h = o * jnp.tanh(c)
        ys.append(h @ w_lin.T + b_lin)                          # (B, 1)
    return jnp.stack(ys, axis=1)                                # (B, T, 1)


def init_params(key, input_size=1, hidden_size=50):
    """PyTorch-layout params, uniform(-1/sqrt(H), 1/sqrt(H))."""
    H, I = hidden_size, input_size
    ks = jax.random.split(key, 6)
    bound = 1.0 / np.sqrt(H)
    w_ih = jax.random.uniform(ks[0], (4 * H, I), jnp.float32, -bound, bound)
    w_hh = jax.random.uniform(ks[1], (4 * H, H), jnp.float32, -bound, bound)
    b_ih = jax.random.uniform(ks[2], (4 * H,), jnp.float32, -bound, bound)
    b_hh = jax.random.uniform(ks[3], (4 * H,), jnp.float32, -bound, bound)
    w_lin = jax.random.uniform(ks[4], (1, H), jnp.float32, -bound, bound)
    b_lin = jax.random.uniform(ks[5], (1,), jnp.float32, -bound, bound)
    return w_ih, w_hh, b_ih, b_hh, w_lin, b_lin


if __name__ == "__main__":
    B, T, I, H = 2, 8, 1, 50

    key = jax.random.PRNGKey(0)
    kx, kp = jax.random.split(key)
    x = jax.random.normal(kx, (B, T, I), jnp.float32)   # (batch, seq, input_size=1)
    params = init_params(kp, input_size=I, hidden_size=H)

    y = jax.block_until_ready(lstm_forward(x, *params))
    y_ref = jax.block_until_ready(lstm_reference(x, *params))

    # Tolerances account for the bf16 recurrent matmul (f32 accumulation).
    np.testing.assert_allclose(np.asarray(y), np.asarray(y_ref), rtol=2e-2, atol=1e-2)
    assert y.shape == (B, T, 1) and y.dtype == jnp.float32

    print("KERNEL_OK")
</pallas_src>

<mosaic_0001>
module attributes {stable_mosaic.version = 11 : i64} {
  func.func @_lstm_kernel(%arg0: i32, %arg1: i32, %arg2: memref<8x8x1xf32, #tpu.memory_space<vmem>>, %arg3: memref<1x512xf32, #tpu.memory_space<vmem>>, %arg4: memref<128x512xbf16, #tpu.memory_space<vmem>>, %arg5: memref<1x512xf32, #tpu.memory_space<vmem>>, %arg6: memref<1x128xf32, #tpu.memory_space<vmem>>, %arg7: memref<1xf32, #tpu.memory_space<smem>>, %arg8: memref<8x8xf32, #tpu.memory_space<vmem>>, %arg9: memref<8x8x512xf32, #tpu.memory_space<vmem>>, %arg10: memref<8x8x128xf32, #tpu.memory_space<vmem>>, %arg11: memref<8x128xf32, #tpu.memory_space<vmem>>, %arg12: memref<8x128xf32, #tpu.memory_space<vmem>>) attributes {dimension_semantics = [#tpu.dimension_semantics<parallel>, #tpu.dimension_semantics<arbitrary>], iteration_bounds = array<i64: 1, 1>, scalar_prefetch = 0 : i64, scratch_operands = 4 : i64, tpu.core_type = #tpu.core_type<tc>, window_params = [{transform_indices = @transform_0, window_bounds = array<i64: 8, 8, 1>}, {pipeline_mode = #tpu.pipeline_mode<synchronous>, transform_indices = @transform_1, window_bounds = array<i64: 1, 512>}, {pipeline_mode = #tpu.pipeline_mode<synchronous>, transform_indices = @transform_2, window_bounds = array<i64: 128, 512>}, {pipeline_mode = #tpu.pipeline_mode<synchronous>, transform_indices = @transform_3, window_bounds = array<i64: 1, 512>}, {pipeline_mode = #tpu.pipeline_mode<synchronous>, transform_indices = @transform_4, window_bounds = array<i64: 1, 128>}, {transform_indices = @transform_5, window_bounds = array<i64: 1>}, {transform_indices = @transform_6, window_bounds = array<i64: 8, 8>}]} {
    %c0_i32 = arith.constant 0 : i32
    %0 = arith.cmpi eq, %arg1, %c0_i32 : i32
    %1 = arith.extui %0 : i1 to i32
    %c0_i32_0 = arith.constant 0 : i32
    %2 = arith.cmpi ne, %1, %c0_i32_0 : i32
    scf.if %2 {
      %cst_147 = arith.constant 0.000000e+00 : f32
      %272 = vector.broadcast %cst_147 : f32 to vector<8x128xf32>
      %c0_148 = arith.constant 0 : index
      %c0_149 = arith.constant 0 : index
      %273 = vector.load %arg11[%c0_148, %c0_149] : memref<8x128xf32, #tpu.memory_space<vmem>>, vector<8x128xf32>
      tpu.vector_store %arg11[%c0_148, %c0_149], %272 {strides = array<i32>} : memref<8x128xf32, #tpu.memory_space<vmem>>, vector<8x128xf32>,
      %cst_150 = arith.constant 0.000000e+00 : f32
      %274 = vector.broadcast %cst_150 : f32 to vector<8x128xf32>
      %c0_151 = arith.constant 0 : index
      %c0_152 = arith.constant 0 : index
      %275 = vector.load %arg12[%c0_151, %c0_152] : memref<8x128xf32, #tpu.memory_space<vmem>>, vector<8x128xf32>
      tpu.vector_store %arg12[%c0_151, %c0_152], %274 {strides = array<i32>} : memref<8x128xf32, #tpu.memory_space<vmem>>, vector<8x128xf32>,
    } else {
    }
    %c0 = arith.constant 0 : index
    %c0_1 = arith.constant 0 : index
    %c0_2 = arith.constant 0 : index
    %3 = vector.load %arg2[%c0, %c0_1, %c0_2] : memref<8x8x1xf32, #tpu.memory_space<vmem>>, vector<8x8x1xf32>
    %c0_3 = arith.constant 0 : index
    %c0_4 = arith.constant 0 : index
    %4 = vector.load %arg3[%c0_3, %c0_4] : memref<1x512xf32, #tpu.memory_space<vmem>>, vector<1x512xf32>
    %5 = vector.shape_cast %4 : vector<1x512xf32> to vector<1x1x512xf32>
    %6 = vector.broadcast %3 : vector<8x8x1xf32> to vector<8x8x512xf32>
    %7 = vector.broadcast %5 : vector<1x1x512xf32> to vector<8x8x512xf32>
    %8 = arith.mulf %6, %7 : vector<8x8x512xf32>
    %c0_5 = arith.constant 0 : index
    %c0_6 = arith.constant 0 : index
    %9 = vector.load %arg5[%c0_5, %c0_6] : memref<1x512xf32, #tpu.memory_space<vmem>>, vector<1x512xf32>
    %10 = vector.shape_cast %9 : vector<1x512xf32> to vector<1x1x512xf32>
    %11 = vector.broadcast %10 : vector<1x1x512xf32> to vector<8x8x512xf32>
    %12 = arith.addf %8, %11 : vector<8x8x512xf32>
    %c0_7 = arith.constant 0 : index
    %c0_8 = arith.constant 0 : index
    %c0_9 = arith.constant 0 : index
    %13 = vector.load %arg9[%c0_7, %c0_8, %c0_9] : memref<8x8x512xf32, #tpu.memory_space<vmem>>, vector<8x8x512xf32>
    tpu.vector_store %arg9[%c0_7, %c0_8, %c0_9], %12 {strides = array<i32>} : memref<8x8x512xf32, #tpu.memory_space<vmem>>, vector<8x8x512xf32>,
    %c0_i32_10 = arith.constant 0 : i32
    %c0_11 = arith.constant 0 : index
    %c0_12 = arith.constant 0 : index
    %14 = vector.load %arg11[%c0_11, %c0_12] : memref<8x128xf32, #tpu.memory_space<vmem>>, vector<8x128xf32>
    %c0_13 = arith.constant 0 : index
    %c0_14 = arith.constant 0 : index
    %15 = vector.load %arg12[%c0_13, %c0_14] : memref<8x128xf32, #tpu.memory_space<vmem>>, vector<8x128xf32>
    %16 = arith.index_cast %c0_i32_10 : i32 to index
    %c0_15 = arith.constant 0 : index
    %c0_16 = arith.constant 0 : index
    %17 = vector.load %arg9[%16, %c0_15, %c0_16] : memref<8x8x512xf32, #tpu.memory_space<vmem>>, vector<1x8x512xf32>
    %18 = vector.shape_cast %17 : vector<1x8x512xf32> to vector<8x512xf32>
    %19 = arith.truncf %14 : vector<8x128xf32> to vector<8x128xbf16>
    %c0_17 = arith.constant 0 : index
    %c0_18 = arith.constant 0 : index
    %20 = vector.load %arg4[%c0_17, %c0_18] : memref<128x512xbf16, #tpu.memory_space<vmem>>, vector<128x512xbf16>
    %cst = arith.constant dense<0.000000e+00> : vector<8x512xf32>
    %21 = tpu.matmul %19, %20, %cst {dimension_numbers = #tpu.dot_dimension_numbers<[1], [0], [0], [1], [0, 0, 1, 1], [], []>} : vector<8x128xbf16>, vector<128x512xbf16>, vector<8x512xf32> -> vector<8x512xf32>
    %22 = arith.addf %18, %21 : vector<8x512xf32>
    %23 = vector.extract_strided_slice %22 {offsets = [0, 0], sizes = [8, 384], strides = [1, 1]} : vector<8x512xf32> to vector<8x384xf32>
    %24 = arith.negf %23 : vector<8x384xf32>
    %25 = math.exp %24 : vector<8x384xf32>
    %cst_19 = arith.constant 1.000000e+00 : f32
    %26 = vector.broadcast %cst_19 : f32 to vector<8x384xf32>
    %27 = arith.addf %26, %25 : vector<8x384xf32>
    %28 = arith.divf %26, %27 : vector<8x384xf32>
    %29 = vector.extract_strided_slice %28 {offsets = [0, 0], sizes = [8, 128], strides = [1, 1]} : vector<8x384xf32> to vector<8x128xf32>
    %30 = vector.extract_strided_slice %28 {offsets = [0, 128], sizes = [8, 128], strides = [1, 1]} : vector<8x384xf32> to vector<8x128xf32>
    %31 = vector.extract_strided_slice %28 {offsets = [0, 256], sizes = [8, 128], strides = [1, 1]} : vector<8x384xf32> to vector<8x128xf32>
    %32 = vector.extract_strided_slice %22 {offsets = [0, 384], sizes = [8, 128], strides = [1, 1]} : vector<8x512xf32> to vector<8x128xf32>
    %33 = math.tanh %32 : vector<8x128xf32>
    %34 = arith.mulf %30, %15 : vector<8x128xf32>
    %35 = arith.mulf %29, %33 : vector<8x128xf32>
    %36 = arith.addf %34, %35 : vector<8x128xf32>
    %37 = math.tanh %36 : vector<8x128xf32>
    %38 = arith.mulf %31, %37 : vector<8x128xf32>
    %c0_20 = arith.constant 0 : index
    %c0_21 = arith.constant 0 : index
    %39 = vector.load %arg11[%c0_20, %c0_21] : memref<8x128xf32, #tpu.memory_space<vmem>>, vector<8x128xf32>
    tpu.vector_store %arg11[%c0_20, %c0_21], %38 {strides = array<i32>} : memref<8x128xf32, #tpu.memory_space<vmem>>, vector<8x128xf32>,
    %c0_22 = arith.constant 0 : index
    %c0_23 = arith.constant 0 : index
    %40 = vector.load %arg12[%c0_22, %c0_23] : memref<8x128xf32, #tpu.memory_space<vmem>>, vector<8x128xf32>
    tpu.vector_store %arg12[%c0_22, %c0_23], %36 {strides = array<i32>} : memref<8x128xf32, #tpu.memory_space<vmem>>, vector<8x128xf32>,
    %41 = arith.index_cast %c0_i32_10 : i32 to index
    %c0_24 = arith.constant 0 : index
    %c0_25 = arith.constant 0 : index
    %42 = vector.load %arg10[%41, %c0_24, %c0_25] : memref<8x8x128xf32, #tpu.memory_space<vmem>>, vector<1x8x128xf32>
    %43 = vector.shape_cast %42 : vector<1x8x128xf32> to vector<8x128xf32>
    %44 = vector.shape_cast %38 : vector<8x128xf32> to vector<1x8x128xf32>
    tpu.vector_store %arg10[%41, %c0_24, %c0_25], %44 {strides = array<i32>} : memref<8x8x128xf32, #tpu.memory_space<vmem>>, vector<1x8x128xf32>,
    %c1_i32 = arith.constant 1 : i32
    %c0_26 = arith.constant 0 : index
    %c0_27 = arith.constant 0 : index
    %45 = vector.load %arg11[%c0_26, %c0_27] : memref<8x128xf32, #tpu.memory_space<vmem>>, vector<8x128xf32>
    %c0_28 = arith.constant 0 : index
    %c0_29 = arith.constant 0 : index
    %46 = vector.load %arg12[%c0_28, %c0_29] : memref<8x128xf32, #tpu.memory_space<vmem>>, vector<8x128xf32>
    %47 = arith.index_cast %c1_i32 : i32 to index
    %c0_30 = arith.constant 0 : index
    %c0_31 = arith.constant 0 : index
    %48 = vector.load %arg9[%47, %c0_30, %c0_31] : memref<8x8x512xf32, #tpu.memory_space<vmem>>, vector<1x8x512xf32>
    %49 = vector.shape_cast %48 : vector<1x8x512xf32> to vector<8x512xf32>
    %50 = arith.truncf %45 : vector<8x128xf32> to vector<8x128xbf16>
    %c0_32 = arith.constant 0 : index
    %c0_33 = arith.constant 0 : index
    %51 = vector.load %arg4[%c0_32, %c0_33] : memref<128x512xbf16, #tpu.memory_space<vmem>>, vector<128x512xbf16>
    %cst_34 = arith.constant dense<0.000000e+00> : vector<8x512xf32>
    %52 = tpu.matmul %50, %51, %cst_34 {dimension_numbers = #tpu.dot_dimension_numbers<[1], [0], [0], [1], [0, 0, 1, 1], [], []>} : vector<8x128xbf16>, vector<128x512xbf16>, vector<8x512xf32> -> vector<8x512xf32>
    %53 = arith.addf %49, %52 : vector<8x512xf32>
    %54 = vector.extract_strided_slice %53 {offsets = [0, 0], sizes = [8, 384], strides = [1, 1]} : vector<8x512xf32> to vector<8x384xf32>
    %55 = arith.negf %54 : vector<8x384xf32>
    %56 = math.exp %55 : vector<8x384xf32>
    %cst_35 = arith.constant 1.000000e+00 : f32
    %57 = vector.broadcast %cst_35 : f32 to vector<8x384xf32>
    %58 = arith.addf %57, %56 : vector<8x384xf32>
    %59 = arith.divf %57, %58 : vector<8x384xf32>
    %60 = vector.extract_strided_slice %59 {offsets = [0, 0], sizes = [8, 128], strides = [1, 1]} : vector<8x384xf32> to vector<8x128xf32>
    %61 = vector.extract_strided_slice %59 {offsets = [0, 128], sizes = [8, 128], strides = [1, 1]} : vector<8x384xf32> to vector<8x128xf32>
    %62 = vector.extract_strided_slice %59 {offsets = [0, 256], sizes = [8, 128], strides = [1, 1]} : vector<8x384xf32> to vector<8x128xf32>
    %63 = vector.extract_strided_slice %53 {offsets = [0, 384], sizes = [8, 128], strides = [1, 1]} : vector<8x512xf32> to vector<8x128xf32>
    %64 = math.tanh %63 : vector<8x128xf32>
    %65 = arith.mulf %61, %46 : vector<8x128xf32>
    %66 = arith.mulf %60, %64 : vector<8x128xf32>
    %67 = arith.addf %65, %66 : vector<8x128xf32>
    %68 = math.tanh %67 : vector<8x128xf32>
    %69 = arith.mulf %62, %68 : vector<8x128xf32>
    %c0_36 = arith.constant 0 : index
    %c0_37 = arith.constant 0 : index
    %70 = vector.load %arg11[%c0_36, %c0_37] : memref<8x128xf32, #tpu.memory_space<vmem>>, vector<8x128xf32>
    tpu.vector_store %arg11[%c0_36, %c0_37], %69 {strides = array<i32>} : memref<8x128xf32, #tpu.memory_space<vmem>>, vector<8x128xf32>,
    %c0_38 = arith.constant 0 : index
    %c0_39 = arith.constant 0 : index
    %71 = vector.load %arg12[%c0_38, %c0_39] : memref<8x128xf32, #tpu.memory_space<vmem>>, vector<8x128xf32>
    tpu.vector_store %arg12[%c0_38, %c0_39], %67 {strides = array<i32>} : memref<8x128xf32, #tpu.memory_space<vmem>>, vector<8x128xf32>,
    %72 = arith.index_cast %c1_i32 : i32 to index
    %c0_40 = arith.constant 0 : index
    %c0_41 = arith.constant 0 : index
    %73 = vector.load %arg10[%72, %c0_40, %c0_41] : memref<8x8x128xf32, #tpu.memory_space<vmem>>, vector<1x8x128xf32>
    %74 = vector.shape_cast %73 : vector<1x8x128xf32> to vector<8x128xf32>
    %75 = vector.shape_cast %69 : vector<8x128xf32> to vector<1x8x128xf32>
    tpu.vector_store %arg10[%72, %c0_40, %c0_41], %75 {strides = array<i32>} : memref<8x8x128xf32, #tpu.memory_space<vmem>>, vector<1x8x128xf32>,
    %c2_i32 = arith.constant 2 : i32
    %c0_42 = arith.constant 0 : index
    %c0_43 = arith.constant 0 : index
    %76 = vector.load %arg11[%c0_42, %c0_43] : memref<8x128xf32, #tpu.memory_space<vmem>>, vector<8x128xf32>
    %c0_44 = arith.constant 0 : index
    %c0_45 = arith.constant 0 : index
    %77 = vector.load %arg12[%c0_44, %c0_45] : memref<8x128xf32, #tpu.memory_space<vmem>>, vector<8x128xf32>
    %78 = arith.index_cast %c2_i32 : i32 to index
    %c0_46 = arith.constant 0 : index
    %c0_47 = arith.constant 0 : index
    %79 = vector.load %arg9[%78, %c0_46, %c0_47] : memref<8x8x512xf32, #tpu.memory_space<vmem>>, vector<1x8x512xf32>
    %80 = vector.shape_cast %79 : vector<1x8x512xf32> to vector<8x512xf32>
    %81 = arith.truncf %76 : vector<8x128xf32> to vector<8x128xbf16>
    %c0_48 = arith.constant 0 : index
    %c0_49 = arith.constant 0 : index
    %82 = vector.load %arg4[%c0_48, %c0_49] : memref<128x512xbf16, #tpu.memory_space<vmem>>, vector<128x512xbf16>
    %cst_50 = arith.constant dense<0.000000e+00> : vector<8x512xf32>
    %83 = tpu.matmul %81, %82, %cst_50 {dimension_numbers = #tpu.dot_dimension_numbers<[1], [0], [0], [1], [0, 0, 1, 1], [], []>} : vector<8x128xbf16>, vector<128x512xbf16>, vector<8x512xf32> -> vector<8x512xf32>
    %84 = arith.addf %80, %83 : vector<8x512xf32>
    %85 = vector.extract_strided_slice %84 {offsets = [0, 0], sizes = [8, 384], strides = [1, 1]} : vector<8x512xf32> to vector<8x384xf32>
    %86 = arith.negf %85 : vector<8x384xf32>
    %87 = math.exp %86 : vector<8x384xf32>
    %cst_51 = arith.constant 1.000000e+00 : f32
    %88 = vector.broadcast %cst_51 : f32 to vector<8x384xf32>
    %89 = arith.addf %88, %87 : vector<8x384xf32>
    %90 = arith.divf %88, %89 : vector<8x384xf32>
    %91 = vector.extract_strided_slice %90 {offsets = [0, 0], sizes = [8, 128], strides = [1, 1]} : vector<8x384xf32> to vector<8x128xf32>
    %92 = vector.extract_strided_slice %90 {offsets = [0, 128], sizes = [8, 128], strides = [1, 1]} : vector<8x384xf32> to vector<8x128xf32>
    %93 = vector.extract_strided_slice %90 {offsets = [0, 256], sizes = [8, 128], strides = [1, 1]} : vector<8x384xf32> to vector<8x128xf32>
    %94 = vector.extract_strided_slice %84 {offsets = [0, 384], sizes = [8, 128], strides = [1, 1]} : vector<8x512xf32> to vector<8x128xf32>
    %95 = math.tanh %94 : vector<8x128xf32>
    %96 = arith.mulf %92, %77 : vector<8x128xf32>
    %97 = arith.mulf %91, %95 : vector<8x128xf32>
    %98 = arith.addf %96, %97 : vector<8x128xf32>
    %99 = math.tanh %98 : vector<8x128xf32>
    %100 = arith.mulf %93, %99 : vector<8x128xf32>
    %c0_52 = arith.constant 0 : index
    %c0_53 = arith.constant 0 : index
    %101 = vector.load %arg11[%c0_52, %c0_53] : memref<8x128xf32, #tpu.memory_space<vmem>>, vector<8x128xf32>
    tpu.vector_store %arg11[%c0_52, %c0_53], %100 {strides = array<i32>} : memref<8x128xf32, #tpu.memory_space<vmem>>, vector<8x128xf32>,
    %c0_54 = arith.constant 0 : index
    %c0_55 = arith.constant 0 : index
    %102 = vector.load %arg12[%c0_54, %c0_55] : memref<8x128xf32, #tpu.memory_space<vmem>>, vector<8x128xf32>
    tpu.vector_store %arg12[%c0_54, %c0_55], %98 {strides = array<i32>} : memref<8x128xf32, #tpu.memory_space<vmem>>, vector<8x128xf32>,
    %103 = arith.index_cast %c2_i32 : i32 to index
    %c0_56 = arith.constant 0 : index
    %c0_57 = arith.constant 0 : index
    %104 = vector.load %arg10[%103, %c0_56, %c0_57] : memref<8x8x128xf32, #tpu.memory_space<vmem>>, vector<1x8x128xf32>
    %105 = vector.shape_cast %104 : vector<1x8x128xf32> to vector<8x128xf32>
    %106 = vector.shape_cast %100 : vector<8x128xf32> to vector<1x8x128xf32>
    tpu.vector_store %arg10[%103, %c0_56, %c0_57], %106 {strides = array<i32>} : memref<8x8x128xf32, #tpu.memory_space<vmem>>, vector<1x8x128xf32>,
    %c3_i32 = arith.constant 3 : i32
    %c0_58 = arith.constant 0 : index
    %c0_59 = arith.constant 0 : index
    %107 = vector.load %arg11[%c0_58, %c0_59] : memref<8x128xf32, #tpu.memory_space<vmem>>, vector<8x128xf32>
    %c0_60 = arith.constant 0 : index
    %c0_61 = arith.constant 0 : index
    %108 = vector.load %arg12[%c0_60, %c0_61] : memref<8x128xf32, #tpu.memory_space<vmem>>, vector<8x128xf32>
    %109 = arith.index_cast %c3_i32 : i32 to index
    %c0_62 = arith.constant 0 : index
    %c0_63 = arith.constant 0 : index
    %110 = vector.load %arg9[%109, %c0_62, %c0_63] : memref<8x8x512xf32, #tpu.memory_space<vmem>>, vector<1x8x512xf32>
    %111 = vector.shape_cast %110 : vector<1x8x512xf32> to vector<8x512xf32>
    %112 = arith.truncf %107 : vector<8x128xf32> to vector<8x128xbf16>
    %c0_64 = arith.constant 0 : index
    %c0_65 = arith.constant 0 : index
    %113 = vector.load %arg4[%c0_64, %c0_65] : memref<128x512xbf16, #tpu.memory_space<vmem>>, vector<128x512xbf16>
    %cst_66 = arith.constant dense<0.000000e+00> : vector<8x512xf32>
    %114 = tpu.matmul %112, %113, %cst_66 {dimension_numbers = #tpu.dot_dimension_numbers<[1], [0], [0], [1], [0, 0, 1, 1], [], []>} : vector<8x128xbf16>, vector<128x512xbf16>, vector<8x512xf32> -> vector<8x512xf32>
    %115 = arith.addf %111, %114 : vector<8x512xf32>
    %116 = vector.extract_strided_slice %115 {offsets = [0, 0], sizes = [8, 384], strides = [1, 1]} : vector<8x512xf32> to vector<8x384xf32>
    %117 = arith.negf %116 : vector<8x384xf32>
    %118 = math.exp %117 : vector<8x384xf32>
    %cst_67 = arith.constant 1.000000e+00 : f32
    %119 = vector.broadcast %cst_67 : f32 to vector<8x384xf32>
    %120 = arith.addf %119, %118 : vector<8x384xf32>
    %121 = arith.divf %119, %120 : vector<8x384xf32>
    %122 = vector.extract_strided_slice %121 {offsets = [0, 0], sizes = [8, 128], strides = [1, 1]} : vector<8x384xf32> to vector<8x128xf32>
    %123 = vector.extract_strided_slice %121 {offsets = [0, 128], sizes = [8, 128], strides = [1, 1]} : vector<8x384xf32> to vector<8x128xf32>
    %124 = vector.extract_strided_slice %121 {offsets = [0, 256], sizes = [8, 128], strides = [1, 1]} : vector<8x384xf32> to vector<8x128xf32>
    %125 = vector.extract_strided_slice %115 {offsets = [0, 384], sizes = [8, 128], strides = [1, 1]} : vector<8x512xf32> to vector<8x128xf32>
    %126 = math.tanh %125 : vector<8x128xf32>
    %127 = arith.mulf %123, %108 : vector<8x128xf32>
    %128 = arith.mulf %122, %126 : vector<8x128xf32>
    %129 = arith.addf %127, %128 : vector<8x128xf32>
    %130 = math.tanh %129 : vector<8x128xf32>
    %131 = arith.mulf %124, %130 : vector<8x128xf32>
    %c0_68 = arith.constant 0 : index
    %c0_69 = arith.constant 0 : index
    %132 = vector.load %arg11[%c0_68, %c0_69] : memref<8x128xf32, #tpu.memory_space<vmem>>, vector<8x128xf32>
    tpu.vector_store %arg11[%c0_68, %c0_69], %131 {strides = array<i32>} : memref<8x128xf32, #tpu.memory_space<vmem>>, vector<8x128xf32>,
    %c0_70 = arith.constant 0 : index
    %c0_71 = arith.constant 0 : index
    %133 = vector.load %arg12[%c0_70, %c0_71] : memref<8x128xf32, #tpu.memory_space<vmem>>, vector<8x128xf32>
    tpu.vector_store %arg12[%c0_70, %c0_71], %129 {strides = array<i32>} : memref<8x128xf32, #tpu.memory_space<vmem>>, vector<8x128xf32>,
    %134 = arith.index_cast %c3_i32 : i32 to index
    %c0_72 = arith.constant 0 : index
    %c0_73 = arith.constant 0 : index
    %135 = vector.load %arg10[%134, %c0_72, %c0_73] : memref<8x8x128xf32, #tpu.memory_space<vmem>>, vector<1x8x128xf32>
    %136 = vector.shape_cast %135 : vector<1x8x128xf32> to vector<8x128xf32>
    %137 = vector.shape_cast %131 : vector<8x128xf32> to vector<1x8x128xf32>
    tpu.vector_store %arg10[%134, %c0_72, %c0_73], %137 {strides = array<i32>} : memref<8x8x128xf32, #tpu.memory_space<vmem>>, vector<1x8x128xf32>,
    %c4_i32 = arith.constant 4 : i32
    %c0_74 = arith.constant 0 : index
    %c0_75 = arith.constant 0 : index
    %138 = vector.load %arg11[%c0_74, %c0_75] : memref<8x128xf32, #tpu.memory_space<vmem>>, vector<8x128xf32>
    %c0_76 = arith.constant 0 : index
    %c0_77 = arith.constant 0 : index
    %139 = vector.load %arg12[%c0_76, %c0_77] : memref<8x128xf32, #tpu.memory_space<vmem>>, vector<8x128xf32>
    %140 = arith.index_cast %c4_i32 : i32 to index
    %c0_78 = arith.constant 0 : index
    %c0_79 = arith.constant 0 : index
    %141 = vector.load %arg9[%140, %c0_78, %c0_79] : memref<8x8x512xf32, #tpu.memory_space<vmem>>, vector<1x8x512xf32>
    %142 = vector.shape_cast %141 : vector<1x8x512xf32> to vector<8x512xf32>
    %143 = arith.truncf %138 : vector<8x128xf32> to vector<8x128xbf16>
    %c0_80 = arith.constant 0 : index
    %c0_81 = arith.constant 0 : index
    %144 = vector.load %arg4[%c0_80, %c0_81] : memref<128x512xbf16, #tpu.memory_space<vmem>>, vector<128x512xbf16>
    %cst_82 = arith.constant dense<0.000000e+00> : vector<8x512xf32>
    %145 = tpu.matmul %143, %144, %cst_82 {dimension_numbers = #tpu.dot_dimension_numbers<[1], [0], [0], [1], [0, 0, 1, 1], [], []>} : vector<8x128xbf16>, vector<128x512xbf16>, vector<8x512xf32> -> vector<8x512xf32>
    %146 = arith.addf %142, %145 : vector<8x512xf32>
    %147 = vector.extract_strided_slice %146 {offsets = [0, 0], sizes = [8, 384], strides = [1, 1]} : vector<8x512xf32> to vector<8x384xf32>
    %148 = arith.negf %147 : vector<8x384xf32>
    %149 = math.exp %148 : vector<8x384xf32>
    %cst_83 = arith.constant 1.000000e+00 : f32
    %150 = vector.broadcast %cst_83 : f32 to vector<8x384xf32>
    %151 = arith.addf %150, %149 : vector<8x384xf32>
    %152 = arith.divf %150, %151 : vector<8x384xf32>
    %153 = vector.extract_strided_slice %152 {offsets = [0, 0], sizes = [8, 128], strides = [1, 1]} : vector<8x384xf32> to vector<8x128xf32>
    %154 = vector.extract_strided_slice %152 {offsets = [0, 128], sizes = [8, 128], strides = [1, 1]} : vector<8x384xf32> to vector<8x128xf32>
    %155 = vector.extract_strided_slice %152 {offsets = [0, 256], sizes = [8, 128], strides = [1, 1]} : vector<8x384xf32> to vector<8x128xf32>
    %156 = vector.extract_strided_slice %146 {offsets = [0, 384], sizes = [8, 128], strides = [1, 1]} : vector<8x512xf32> to vector<8x128xf32>
    %157 = math.tanh %156 : vector<8x128xf32>
    %158 = arith.mulf %154, %139 : vector<8x128xf32>
    %159 = arith.mulf %153, %157 : vector<8x128xf32>
    %160 = arith.addf %158, %159 : vector<8x128xf32>
    %161 = math.tanh %160 : vector<8x128xf32>
    %162 = arith.mulf %155, %161 : vector<8x128xf32>
    %c0_84 = arith.constant 0 : index
    %c0_85 = arith.constant 0 : index
    %163 = vector.load %arg11[%c0_84, %c0_85] : memref<8x128xf32, #tpu.memory_space<vmem>>, vector<8x128xf32>
    tpu.vector_store %arg11[%c0_84, %c0_85], %162 {strides = array<i32>} : memref<8x128xf32, #tpu.memory_space<vmem>>, vector<8x128xf32>,
    %c0_86 = arith.constant 0 : index
    %c0_87 = arith.constant 0 : index
    %164 = vector.load %arg12[%c0_86, %c0_87] : memref<8x128xf32, #tpu.memory_space<vmem>>, vector<8x128xf32>
    tpu.vector_store %arg12[%c0_86, %c0_87], %160 {strides = array<i32>} : memref<8x128xf32, #tpu.memory_space<vmem>>, vector<8x128xf32>,
    %165 = arith.index_cast %c4_i32 : i32 to index
    %c0_88 = arith.constant 0 : index
    %c0_89 = arith.constant 0 : index
    %166 = vector.load %arg10[%165, %c0_88, %c0_89] : memref<8x8x128xf32, #tpu.memory_space<vmem>>, vector<1x8x128xf32>
    %167 = vector.shape_cast %166 : vector<1x8x128xf32> to vector<8x128xf32>
    %168 = vector.shape_cast %162 : vector<8x128xf32> to vector<1x8x128xf32>
    tpu.vector_store %arg10[%165, %c0_88, %c0_89], %168 {strides = array<i32>} : memref<8x8x128xf32, #tpu.memory_space<vmem>>, vector<1x8x128xf32>,
    %c5_i32 = arith.constant 5 : i32
    %c0_90 = arith.constant 0 : index
    %c0_91 = arith.constant 0 : index
    %169 = vector.load %arg11[%c0_90, %c0_91] : memref<8x128xf32, #tpu.memory_space<vmem>>, vector<8x128xf32>
    %c0_92 = arith.constant 0 : index
    %c0_93 = arith.constant 0 : index
    %170 = vector.load %arg12[%c0_92, %c0_93] : memref<8x128xf32, #tpu.memory_space<vmem>>, vector<8x128xf32>
    %171 = arith.index_cast %c5_i32 : i32 to index
    %c0_94 = arith.constant 0 : index
    %c0_95 = arith.constant 0 : index
    %172 = vector.load %arg9[%171, %c0_94, %c0_95] : memref<8x8x512xf32, #tpu.memory_space<vmem>>, vector<1x8x512xf32>
    %173 = vector.shape_cast %172 : vector<1x8x512xf32> to vector<8x512xf32>
    %174 = arith.truncf %169 : vector<8x128xf32> to vector<8x128xbf16>
    %c0_96 = arith.constant 0 : index
    %c0_97 = arith.constant 0 : index
    %175 = vector.load %arg4[%c0_96, %c0_97] : memref<128x512xbf16, #tpu.memory_space<vmem>>, vector<128x512xbf16>
    %cst_98 = arith.constant dense<0.000000e+00> : vector<8x512xf32>
    %176 = tpu.matmul %174, %175, %cst_98 {dimension_numbers = #tpu.dot_dimension_numbers<[1], [0], [0], [1], [0, 0, 1, 1], [], []>} : vector<8x128xbf16>, vector<128x512xbf16>, vector<8x512xf32> -> vector<8x512xf32>
    %177 = arith.addf %173, %176 : vector<8x512xf32>
    %178 = vector.extract_strided_slice %177 {offsets = [0, 0], sizes = [8, 384], strides = [1, 1]} : vector<8x512xf32> to vector<8x384xf32>
    %179 = arith.negf %178 : vector<8x384xf32>
    %180 = math.exp %179 : vector<8x384xf32>
    %cst_99 = arith.constant 1.000000e+00 : f32
    %181 = vector.broadcast %cst_99 : f32 to vector<8x384xf32>
    %182 = arith.addf %181, %180 : vector<8x384xf32>
    %183 = arith.divf %181, %182 : vector<8x384xf32>
    %184 = vector.extract_strided_slice %183 {offsets = [0, 0], sizes = [8, 128], strides = [1, 1]} : vector<8x384xf32> to vector<8x128xf32>
    %185 = vector.extract_strided_slice %183 {offsets = [0, 128], sizes = [8, 128], strides = [1, 1]} : vector<8x384xf32> to vector<8x128xf32>
    %186 = vector.extract_strided_slice %183 {offsets = [0, 256], sizes = [8, 128], strides = [1, 1]} : vector<8x384xf32> to vector<8x128xf32>
    %187 = vector.extract_strided_slice %177 {offsets = [0, 384], sizes = [8, 128], strides = [1, 1]} : vector<8x512xf32> to vector<8x128xf32>
    %188 = math.tanh %187 : vector<8x128xf32>
    %189 = arith.mulf %185, %170 : vector<8x128xf32>
    %190 = arith.mulf %184, %188 : vector<8x128xf32>
    %191 = arith.addf %189, %190 : vector<8x128xf32>
    %192 = math.tanh %191 : vector<8x128xf32>
    %193 = arith.mulf %186, %192 : vector<8x128xf32>
    %c0_100 = arith.constant 0 : index
    %c0_101 = arith.constant 0 : index
    %194 = vector.load %arg11[%c0_100, %c0_101] : memref<8x128xf32, #tpu.memory_space<vmem>>, vector<8x128xf32>
    tpu.vector_store %arg11[%c0_100, %c0_101], %193 {strides = array<i32>} : memref<8x128xf32, #tpu.memory_space<vmem>>, vector<8x128xf32>,
    %c0_102 = arith.constant 0 : index
    %c0_103 = arith.constant 0 : index
    %195 = vector.load %arg12[%c0_102, %c0_103] : memref<8x128xf32, #tpu.memory_space<vmem>>, vector<8x128xf32>
    tpu.vector_store %arg12[%c0_102, %c0_103], %191 {strides = array<i32>} : memref<8x128xf32, #tpu.memory_space<vmem>>, vector<8x128xf32>,
    %196 = arith.index_cast %c5_i32 : i32 to index
    %c0_104 = arith.constant 0 : index
    %c0_105 = arith.constant 0 : index
    %197 = vector.load %arg10[%196, %c0_104, %c0_105] : memref<8x8x128xf32, #tpu.memory_space<vmem>>, vector<1x8x128xf32>
    %198 = vector.shape_cast %197 : vector<1x8x128xf32> to vector<8x128xf32>
    %199 = vector.shape_cast %193 : vector<8x128xf32> to vector<1x8x128xf32>
    tpu.vector_store %arg10[%196, %c0_104, %c0_105], %199 {strides = array<i32>} : memref<8x8x128xf32, #tpu.memory_space<vmem>>, vector<1x8x128xf32>,
    %c6_i32 = arith.constant 6 : i32
    %c0_106 = arith.constant 0 : index
    %c0_107 = arith.constant 0 : index
    %200 = vector.load %arg11[%c0_106, %c0_107] : memref<8x128xf32, #tpu.memory_space<vmem>>, vector<8x128xf32>
    %c0_108 = arith.constant 0 : index
    %c0_109 = arith.constant 0 : index
    %201 = vector.load %arg12[%c0_108, %c0_109] : memref<8x128xf32, #tpu.memory_space<vmem>>, vector<8x128xf32>
    %202 = arith.index_cast %c6_i32 : i32 to index
    %c0_110 = arith.constant 0 : index
    %c0_111 = arith.constant 0 : index
    %203 = vector.load %arg9[%202, %c0_110, %c0_111] : memref<8x8x512xf32, #tpu.memory_space<vmem>>, vector<1x8x512xf32>
    %204 = vector.shape_cast %203 : vector<1x8x512xf32> to vector<8x512xf32>
    %205 = arith.truncf %200 : vector<8x128xf32> to vector<8x128xbf16>
    %c0_112 = arith.constant 0 : index
    %c0_113 = arith.constant 0 : index
    %206 = vector.load %arg4[%c0_112, %c0_113] : memref<128x512xbf16, #tpu.memory_space<vmem>>, vector<128x512xbf16>
    %cst_114 = arith.constant dense<0.000000e+00> : vector<8x512xf32>
    %207 = tpu.matmul %205, %206, %cst_114 {dimension_numbers = #tpu.dot_dimension_numbers<[1], [0], [0], [1], [0, 0, 1, 1], [], []>} : vector<8x128xbf16>, vector<128x512xbf16>, vector<8x512xf32> -> vector<8x512xf32>
    %208 = arith.addf %204, %207 : vector<8x512xf32>
    %209 = vector.extract_strided_slice %208 {offsets = [0, 0], sizes = [8, 384], strides = [1, 1]} : vector<8x512xf32> to vector<8x384xf32>
    %210 = arith.negf %209 : vector<8x384xf32>
    %211 = math.exp %210 : vector<8x384xf32>
    %cst_115 = arith.constant 1.000000e+00 : f32
    %212 = vector.broadcast %cst_115 : f32 to vector<8x384xf32>
    %213 = arith.addf %212, %211 : vector<8x384xf32>
    %214 = arith.divf %212, %213 : vector<8x384xf32>
    %215 = vector.extract_strided_slice %214 {offsets = [0, 0], sizes = [8, 128], strides = [1, 1]} : vector<8x384xf32> to vector<8x128xf32>
    %216 = vector.extract_strided_slice %214 {offsets = [0, 128], sizes = [8, 128], strides = [1, 1]} : vector<8x384xf32> to vector<8x128xf32>
    %217 = vector.extract_strided_slice %214 {offsets = [0, 256], sizes = [8, 128], strides = [1, 1]} : vector<8x384xf32> to vector<8x128xf32>
    %218 = vector.extract_strided_slice %208 {offsets = [0, 384], sizes = [8, 128], strides = [1, 1]} : vector<8x512xf32> to vector<8x128xf32>
    %219 = math.tanh %218 : vector<8x128xf32>
    %220 = arith.mulf %216, %201 : vector<8x128xf32>
    %221 = arith.mulf %215, %219 : vector<8x128xf32>
    %222 = arith.addf %220, %221 : vector<8x128xf32>
    %223 = math.tanh %222 : vector<8x128xf32>
    %224 = arith.mulf %217, %223 : vector<8x128xf32>
    %c0_116 = arith.constant 0 : index
    %c0_117 = arith.constant 0 : index
    %225 = vector.load %arg11[%c0_116, %c0_117] : memref<8x128xf32, #tpu.memory_space<vmem>>, vector<8x128xf32>
    tpu.vector_store %arg11[%c0_116, %c0_117], %224 {strides = array<i32>} : memref<8x128xf32, #tpu.memory_space<vmem>>, vector<8x128xf32>,
    %c0_118 = arith.constant 0 : index
    %c0_119 = arith.constant 0 : index
    %226 = vector.load %arg12[%c0_118, %c0_119] : memref<8x128xf32, #tpu.memory_space<vmem>>, vector<8x128xf32>
    tpu.vector_store %arg12[%c0_118, %c0_119], %222 {strides = array<i32>} : memref<8x128xf32, #tpu.memory_space<vmem>>, vector<8x128xf32>,
    %227 = arith.index_cast %c6_i32 : i32 to index
    %c0_120 = arith.constant 0 : index
    %c0_121 = arith.constant 0 : index
    %228 = vector.load %arg10[%227, %c0_120, %c0_121] : memref<8x8x128xf32, #tpu.memory_space<vmem>>, vector<1x8x128xf32>
    %229 = vector.shape_cast %228 : vector<1x8x128xf32> to vector<8x128xf32>
    %230 = vector.shape_cast %224 : vector<8x128xf32> to vector<1x8x128xf32>
    tpu.vector_store %arg10[%227, %c0_120, %c0_121], %230 {strides = array<i32>} : memref<8x8x128xf32, #tpu.memory_space<vmem>>, vector<1x8x128xf32>,
    %c7_i32 = arith.constant 7 : i32
    %c0_122 = arith.constant 0 : index
    %c0_123 = arith.constant 0 : index
    %231 = vector.load %arg11[%c0_122, %c0_123] : memref<8x128xf32, #tpu.memory_space<vmem>>, vector<8x128xf32>
    %c0_124 = arith.constant 0 : index
    %c0_125 = arith.constant 0 : index
    %232 = vector.load %arg12[%c0_124, %c0_125] : memref<8x128xf32, #tpu.memory_space<vmem>>, vector<8x128xf32>
    %233 = arith.index_cast %c7_i32 : i32 to index
    %c0_126 = arith.constant 0 : index
    %c0_127 = arith.constant 0 : index
    %234 = vector.load %arg9[%233, %c0_126, %c0_127] : memref<8x8x512xf32, #tpu.memory_space<vmem>>, vector<1x8x512xf32>
    %235 = vector.shape_cast %234 : vector<1x8x512xf32> to vector<8x512xf32>
    %236 = arith.truncf %231 : vector<8x128xf32> to vector<8x128xbf16>
    %c0_128 = arith.constant 0 : index
    %c0_129 = arith.constant 0 : index
    %237 = vector.load %arg4[%c0_128, %c0_129] : memref<128x512xbf16, #tpu.memory_space<vmem>>, vector<128x512xbf16>
    %cst_130 = arith.constant dense<0.000000e+00> : vector<8x512xf32>
    %238 = tpu.matmul %236, %237, %cst_130 {dimension_numbers = #tpu.dot_dimension_numbers<[1], [0], [0], [1], [0, 0, 1, 1], [], []>} : vector<8x128xbf16>, vector<128x512xbf16>, vector<8x512xf32> -> vector<8x512xf32>
    %239 = arith.addf %235, %238 : vector<8x512xf32>
    %240 = vector.extract_strided_slice %239 {offsets = [0, 0], sizes = [8, 384], strides = [1, 1]} : vector<8x512xf32> to vector<8x384xf32>
    %241 = arith.negf %240 : vector<8x384xf32>
    %242 = math.exp %241 : vector<8x384xf32>
    %cst_131 = arith.constant 1.000000e+00 : f32
    %243 = vector.broadcast %cst_131 : f32 to vector<8x384xf32>
    %244 = arith.addf %243, %242 : vector<8x384xf32>
    %245 = arith.divf %243, %244 : vector<8x384xf32>
    %246 = vector.extract_strided_slice %245 {offsets = [0, 0], sizes = [8, 128], strides = [1, 1]} : vector<8x384xf32> to vector<8x128xf32>
    %247 = vector.extract_strided_slice %245 {offsets = [0, 128], sizes = [8, 128], strides = [1, 1]} : vector<8x384xf32> to vector<8x128xf32>
    %248 = vector.extract_strided_slice %245 {offsets = [0, 256], sizes = [8, 128], strides = [1, 1]} : vector<8x384xf32> to vector<8x128xf32>
    %249 = vector.extract_strided_slice %239 {offsets = [0, 384], sizes = [8, 128], strides = [1, 1]} : vector<8x512xf32> to vector<8x128xf32>
    %250 = math.tanh %249 : vector<8x128xf32>
    %251 = arith.mulf %247, %232 : vector<8x128xf32>
    %252 = arith.mulf %246, %250 : vector<8x128xf32>
    %253 = arith.addf %251, %252 : vector<8x128xf32>
    %254 = math.tanh %253 : vector<8x128xf32>
    %255 = arith.mulf %248, %254 : vector<8x128xf32>
    %c0_132 = arith.constant 0 : index
    %c0_133 = arith.constant 0 : index
    %256 = vector.load %arg11[%c0_132, %c0_133] : memref<8x128xf32, #tpu.memory_space<vmem>>, vector<8x128xf32>
    tpu.vector_store %arg11[%c0_132, %c0_133], %255 {strides = array<i32>} : memref<8x128xf32, #tpu.memory_space<vmem>>, vector<8x128xf32>,
    %c0_134 = arith.constant 0 : index
    %c0_135 = arith.constant 0 : index
    %257 = vector.load %arg12[%c0_134, %c0_135] : memref<8x128xf32, #tpu.memory_space<vmem>>, vector<8x128xf32>
    tpu.vector_store %arg12[%c0_134, %c0_135], %253 {strides = array<i32>} : memref<8x128xf32, #tpu.memory_space<vmem>>, vector<8x128xf32>,
    %258 = arith.index_cast %c7_i32 : i32 to index
    %c0_136 = arith.constant 0 : index
    %c0_137 = arith.constant 0 : index
    %259 = vector.load %arg10[%258, %c0_136, %c0_137] : memref<8x8x128xf32, #tpu.memory_space<vmem>>, vector<1x8x128xf32>
    %260 = vector.shape_cast %259 : vector<1x8x128xf32> to vector<8x128xf32>
    %261 = vector.shape_cast %255 : vector<8x128xf32> to vector<1x8x128xf32>
    tpu.vector_store %arg10[%258, %c0_136, %c0_137], %261 {strides = array<i32>} : memref<8x8x128xf32, #tpu.memory_space<vmem>>, vector<1x8x128xf32>,
    %c8_i32 = arith.constant 8 : i32
    %c0_138 = arith.constant 0 : index
    %c0_139 = arith.constant 0 : index
    %c0_140 = arith.constant 0 : index
    %262 = vector.load %arg10[%c0_138, %c0_139, %c0_140] : memref<8x8x128xf32, #tpu.memory_space<vmem>>, vector<8x8x128xf32>
    %c0_141 = arith.constant 0 : index
    %c0_142 = arith.constant 0 : index
    %263 = vector.load %arg6[%c0_141, %c0_142] : memref<1x128xf32, #tpu.memory_space<vmem>>, vector<1x128xf32>
    %264 = vector.shape_cast %263 : vector<1x128xf32> to vector<1x1x128xf32>
    %265 = vector.broadcast %264 : vector<1x1x128xf32> to vector<8x8x128xf32>
    %266 = arith.mulf %262, %265 : vector<8x8x128xf32>
    %cst_143 = arith.constant dense<0.000000e+00> : vector<8x8xf32>
    %267 = vector.multi_reduction <add>, %266, %cst_143 [2] : vector<8x8x128xf32> to vector<8x8xf32>
    %c0_144 = arith.constant 0 : index
    %268 = memref.load %arg7[%c0_144] : memref<1xf32, #tpu.memory_space<smem>>
    %269 = vector.broadcast %268 : f32 to vector<8x8xf32>
    %270 = arith.addf %267, %269 : vector<8x8xf32>
    %c0_145 = arith.constant 0 : index
    %c0_146 = arith.constant 0 : index
    %271 = vector.load %arg8[%c0_145, %c0_146] : memref<8x8xf32, #tpu.memory_space<vmem>>, vector<8x8xf32>
    tpu.vector_store %arg8[%c0_145, %c0_146], %270 {strides = array<i32>} : memref<8x8xf32, #tpu.memory_space<vmem>>, vector<8x8xf32>,
    return
  }
  func.func @transform_0(%arg0: i32, %arg1: i32) -> (i32, i32, i32) {
    %c0_i32 = arith.constant 0 : i32
    %c0_i32_0 = arith.constant 0 : i32
    return %arg1, %arg0, %c0_i32 : i32, i32, i32
  }
  func.func @transform_1(%arg0: i32, %arg1: i32) -> (i32, i32) {
    %c0_i32 = arith.constant 0 : i32
    %c0_i32_0 = arith.constant 0 : i32
    %c0_i32_1 = arith.constant 0 : i32
    return %c0_i32, %c0_i32_0 : i32, i32
  }
  func.func @transform_2(%arg0: i32, %arg1: i32) -> (i32, i32) {
    %c0_i32 = arith.constant 0 : i32
    %c0_i32_0 = arith.constant 0 : i32
    %c0_i32_1 = arith.constant 0 : i32
    return %c0_i32, %c0_i32_0 : i32, i32
  }
  func.func @transform_3(%arg0: i32, %arg1: i32) -> (i32, i32) {
    %c0_i32 = arith.constant 0 : i32
    %c0_i32_0 = arith.constant 0 : i32
    %c0_i32_1 = arith.constant 0 : i32
    return %c0_i32, %c0_i32_0 : i32, i32
  }
  func.func @transform_4(%arg0: i32, %arg1: i32) -> (i32, i32) {
    %c0_i32 = arith.constant 0 : i32
    %c0_i32_0 = arith.constant 0 : i32
    %c0_i32_1 = arith.constant 0 : i32
    return %c0_i32, %c0_i32_0 : i32, i32
  }
  func.func @transform_5(%arg0: i32, %arg1: i32) -> i32 {
    %c0_i32 = arith.constant 0 : i32
    %c0_i32_0 = arith.constant 0 : i32
    return %c0_i32 : i32
  }
  func.func @transform_6(%arg0: i32, %arg1: i32) -> (i32, i32) {
    %c0_i32 = arith.constant 0 : i32
    return %arg1, %arg0 : i32, i32
  }
}

</mosaic_0001>

<bundles_post_ra>
// kernel: lstm_forward.1
= control target key start
LH: loop header
LB: loop body
LE: loop exit
PB: predicated region body
PF: predicated region fallthrough
CT: control target
= control target key end

     0   :  { %v3351_v1 = vmov 0   ;;  %v3352_v37 = vmov 0.0|0.0   ;;  %v81_v38 = vlaneseq  ;;  %vm2820_vm0 = vcmask 1041409   ;;  %s4145_s2 = inlined_call_operand.vmem [shape: bf16[128,512], index: 2, kind: input, shape index: {}]   ;;  %s4146_s0 = inlined_call_operand.vmem [shape: f32[8,8,1], index: 0, kind: input, shape index: {}]   ;;  %s4147_s1 = inlined_call_operand.vmem [shape: f32[1,512], index: 1, kind: input, shape index: {}]   ;;  %s4148_s3 = inlined_call_operand.vmem [shape: f32[1,512], index: 3, kind: input, shape index: {}]   ;;  %s4149_s4 = inlined_call_operand.vmem [shape: f32[1,128], index: 4, kind: input, shape index: {}]   ;;  %s4150_s5 = inlined_call_operand.<no memory space> [shape: f32[1], index: 5, kind: input, shape index: {}]   ;;  %s4151_s6 = inlined_call_operand.vmem [shape: f32[8,8], index: 6, kind: output, shape index: {}]  }
   0x1   :  { %v3391_v0 = vld [vmem:[%s4145_s2 + $0xe4] ss:$16 sps:$4 sm:$0xff]   ;;  %450 = vmatprep.mubr.bf16.mxu0 %v3351_v1  ;;  %491 = vmatprep.mubr.bf16.mxu1 %v3351_v1  ;;  %v3398_v2 = vld [vmem:[%s4145_s2 + $0xec] ss:$16 sps:$4 sm:$0xff]   ;;  %v3406_v3 = vld [vmem:[%s4145_s2 + $0xe0] ss:$16 sps:$4 sm:$0xff]  }
   0x2   :  { %3124 = vset.pattern.permute.xlu0 %v3351_v1  ;;  %3125 = vset.pattern.permute.xlu1 %v3351_v1  ;;  %v3411_v4 = vld [vmem:[%s4145_s2 + $0xe8] ss:$16 sps:$4 sm:$0xff]   ;;  %v3417_v5 = vld [vmem:[%s4145_s2 + $0xc4] ss:$16 sps:$4 sm:$0xff]   ;;  %v3424_v6 = vld [vmem:[%s4145_s2 + $0xcc] ss:$16 sps:$4 sm:$0xff]  }
   0x3   :  { %418 = vmatprep.subr.bf16.mxu0 %v3391_v0  ;;  %459 = vmatprep.subr.bf16.mxu1 %v3398_v2  ;;  %v3429_v7 = vld [vmem:[%s4145_s2 + $0xc0] ss:$16 sps:$4 sm:$0xff]   ;;  %v3435_v8 = vld [vmem:[%s4145_s2 + $0xc8] ss:$16 sps:$4 sm:$0xff]   ;;  %v3441_v9 = vld [vmem:[%s4145_s2 + $0xa4] ss:$16 sps:$4 sm:$0xff]  }
   0x4   :  { %419 = vmatpush1.bf16.msra.mxu0 %v3406_v3  ;;  %460 = vmatpush1.bf16.msra.mxu1 %v3411_v4  ;;  %v3446_v10 = vld [vmem:[%s4145_s2 + $0xac] ss:$16 sps:$4 sm:$0xff]   ;;  %v3451_v11 = vld [vmem:[%s4145_s2 + $0xa0] ss:$16 sps:$4 sm:$0xff]   ;;  %v3456_v12 = vld [vmem:[%s4145_s2 + $0xa8] ss:$16 sps:$4 sm:$0xff]  }
   0x5   :  { %420 = vmatprep.subr.bf16.mxu0 %v3417_v5  ;;  %461 = vmatprep.subr.bf16.mxu1 %v3424_v6  ;;  %v3463_v13 = vld [vmem:[%s4145_s2 + $0x84] ss:$16 sps:$4 sm:$0xff]   ;;  %v3470_v14 = vld [vmem:[%s4145_s2 + $0x8c] ss:$16 sps:$4 sm:$0xff]   ;;  %v3475_v15 = vld [vmem:[%s4145_s2 + $0x80] ss:$16 sps:$4 sm:$0xff]  }
   0x6   :  { %v3482_v16 = vld [vmem:[%s4145_s2 + $0x88] ss:$16 sps:$4 sm:$0xff]   ;;  %v3487_v17 = vld [vmem:[%s4145_s2 + $0x64] ss:$16 sps:$4 sm:$0xff]   ;;  %v3494_v18 = vld [vmem:[%s4145_s2 + $0x6c] ss:$16 sps:$4 sm:$0xff]  }
   0x7   :  { %v3499_v19 = vld [vmem:[%s4145_s2 + $0x60] ss:$16 sps:$4 sm:$0xff]   ;;  %v3504_v20 = vld [vmem:[%s4145_s2 + $0x68] ss:$16 sps:$4 sm:$0xff]   ;;  %v3511_v21 = vld [vmem:[%s4145_s2 + $0x44] ss:$16 sps:$4 sm:$0xff]  }
   0x8   :  { %421 = vmatpush1.bf16.msra.mxu0 %v3429_v7  ;;  %462 = vmatpush1.bf16.msra.mxu1 %v3435_v8  ;;  %v3518_v22 = vld [vmem:[%s4145_s2 + $0x4c] ss:$16 sps:$4 sm:$0xff]   ;;  %v3525_v23 = vld [vmem:[%s4145_s2 + $0x40] ss:$16 sps:$4 sm:$0xff]   ;;  %v3530_v24 = vld [vmem:[%s4145_s2 + $0x48] ss:$16 sps:$4 sm:$0xff]  }
   0x9   :  { %422 = vmatprep.subr.bf16.mxu0 %v3441_v9  ;;  %463 = vmatprep.subr.bf16.mxu1 %v3446_v10  ;;  %v3537_v25 = vld [vmem:[%s4145_s2 + $0x24] ss:$16 sps:$4 sm:$0xff]   ;;  %v3542_v26 = vld [vmem:[%s4145_s2 + $0x2c] ss:$16 sps:$4 sm:$0xff]   ;;  %v3550_v28 = vld [vmem:[%s4145_s2 + $0x20] ss:$16 sps:$4 sm:$0xff]  }
   0xa   :  { %v31_v27 = vld [vmem:[%s4146_s0] sm:$0xff]  ;;  %v3555_v29 = vld [vmem:[%s4145_s2 + $0x28] ss:$16 sps:$4 sm:$0xff]   ;;  %v3568_v32 = vld [vmem:[%s4145_s2 + $0xc] ss:$16 sps:$4 sm:$0xff]   ;;  %v3633_v39 = vshrl.u32 %v81_v38, 7 }
   0xb   :  { %42 = vperm.xlu0 %3124, %v31_v27   ;;  %v32_v30 = vld [vmem:[%s4146_s0 + $0x8] sm:$0xff]  ;;  %v3563_v31 = vld [vmem:[%s4145_s2 + $0x4] ss:$16 sps:$4 sm:$0xff]   ;;  %v3580_v34 = vld [vmem:[%s4145_s2] ss:$16 sps:$4 sm:$0xff]   ;;  %vm2822_vm1 = vcmask 1042434  }
   0xc   :  { %423 = vmatpush1.bf16.msra.mxu0 %v3451_v11  ;;  %464 = vmatpush1.bf16.msra.mxu1 %v3456_v12  ;;  %v35_v33 = vld [vmem:[%s4146_s0 + $0x20] sm:$0xff]  ;;  %v3585_v35 = vld [vmem:[%s4145_s2 + $0x8] ss:$16 sps:$4 sm:$0xff]   ;;  %v37_v36 = vld [vmem:[%s4146_s0 + $0x30] sm:$0xff]  ;;  %v83_v40 = vsub.s32 0, %v3633_v39  ;;  %v87_v42 = vsub.s32 1, %v3633_v39 }
   0xd   :  { %424 = vmatprep.subr.bf16.mxu0 %v3463_v13  ;;  %465 = vmatprep.subr.bf16.mxu1 %v3470_v14  ;;  %v39_v41 = vld [vmem:[%s4147_s1] sm:$0xf]  ;;  %v91_v51 = vsub.s32 2, %v3633_v39  ;;  %v95_v59 = vsub.s32 3, %v3633_v39  ;;  %vm2824_vm2 = vcmask 1043459   ;;  %vm2826_vm3 = vcmask 1044484  }
   0xe   :  { %v3640_v43 = vrot.slane %v39_v41, %v83_v40  ;;  %v133_v44 = vld [vmem:[%s4148_s3] sm:$0xf]  ;;  %v3645_v45 = vrot.slane %v39_v41, %v87_v42  ;;  %vm2828_vm4 = vcmask 1045509   ;;  %vm2830_vm5 = vcmask 1046534  }
   0xf   :  { %47 = vperm.xlu0 %3124, %v32_v30   ;;  %v3648_v48 = vrot.slane %v133_v44, %v83_v40  ;;  %v3651_v50 = vrot.slane %v133_v44, %v87_v42  ;;  %v3656_v55 = vrot.slane %v39_v41, %v91_v51  ;;  %v3660_v27 = vrot.slane %v133_v44, %v91_v51 }
  0x10   :  { %425 = vmatpush1.bf16.msra.mxu0 %v3475_v15  ;;  %466 = vmatpush1.bf16.msra.mxu1 %v3482_v16  ;;  %vm2832_vm6 = vcmask 1047559   ;;  %vm2835_vm7 = vcmask 64512  }
  0x11   :  { %426 = vmatprep.subr.bf16.mxu0 %v3487_v17  ;;  %467 = vmatprep.subr.bf16.mxu1 %v3494_v18 }
  0x13   :  { %62 = vperm.xlu0 %3124, %v35_v33  }
  0x14   :  { %427 = vmatpush1.bf16.msra.mxu0 %v3499_v19  ;;  %468 = vmatpush1.bf16.msra.mxu1 %v3504_v20 }
  0x15   :  { %428 = vmatprep.subr.bf16.mxu0 %v3511_v21  ;;  %469 = vmatprep.subr.bf16.mxu1 %v3518_v22 }
  0x17   :  { %72 = vperm.xlu0 %3124, %v37_v36  }
  0x18   :  { %429 = vmatpush1.bf16.msra.mxu0 %v3525_v23  ;;  %470 = vmatpush1.bf16.msra.mxu1 %v3530_v24 }
  0x19   :  { %430 = vmatprep.subr.bf16.mxu0 %v3537_v25  ;;  %471 = vmatprep.subr.bf16.mxu1 %v3542_v26 }
  0x1c   :  { %431 = vmatpush1.bf16.msra.mxu0 %v3550_v28  ;;  %472 = vmatpush1.bf16.msra.mxu1 %v3555_v29 }
  0x1d   :  { %432 = vmatprep.subr.bf16.mxu0 %v3563_v31  ;;  %473 = vmatprep.subr.bf16.mxu1 %v3568_v32 }
  0x20   :  { %433 = vmatpush1.bf16.msra.mxu0 %v3580_v34  ;;  %474 = vmatpush1.bf16.msra.mxu1 %v3585_v35 }
  0x21   :  { %731 = vmatprep.subr.bf16.mxu0 %v3391_v0  ;;  %772 = vmatprep.subr.bf16.mxu1 %v3398_v2 }
  0x23   :  { %451 = vmatmul.mubr.bf16.vlgmr.msra.gmra.mxu0 %v3352_v37  ;;  %492 = vmatmul.mubr.bf16.vlgmr.msra.gmra.mxu1 %v3352_v37  ;;  %v3662_v37 = vrot.slane %v39_v41, %v95_v59 }
  0x24   :  { %732 = vmatpush1.bf16.msra.mxu0 %v3406_v3  ;;  %773 = vmatpush1.bf16.msra.mxu1 %v3411_v4 }
  0x25   :  { %733 = vmatprep.subr.bf16.mxu0 %v3417_v5  ;;  %774 = vmatprep.subr.bf16.mxu1 %v3424_v6 }
  0x26   :  { %763 = vmatprep.mubr.bf16.mxu0 %v3351_v1  ;;  %804 = vmatprep.mubr.bf16.mxu1 %v3351_v1 }
  0x28   :  { %734 = vmatpush1.bf16.msra.mxu0 %v3429_v7  ;;  %775 = vmatpush1.bf16.msra.mxu1 %v3435_v8 }
  0x29   :  { %735 = vmatprep.subr.bf16.mxu0 %v3441_v9  ;;  %776 = vmatprep.subr.bf16.mxu1 %v3446_v10 }
  0x2c   :  { %736 = vmatpush1.bf16.msra.mxu0 %v3451_v11  ;;  %777 = vmatpush1.bf16.msra.mxu1 %v3456_v12 }
  0x2d   :  { %737 = vmatprep.subr.bf16.mxu0 %v3463_v13  ;;  %778 = vmatprep.subr.bf16.mxu1 %v3470_v14 }
  0x30   :  { %738 = vmatpush1.bf16.msra.mxu0 %v3475_v15  ;;  %779 = vmatpush1.bf16.msra.mxu1 %v3482_v16 }
  0x31   :  { %739 = vmatprep.subr.bf16.mxu0 %v3487_v17  ;;  %780 = vmatprep.subr.bf16.mxu1 %v3494_v18 }
  0x34   :  { %740 = vmatpush1.bf16.msra.mxu0 %v3499_v19  ;;  %781 = vmatpush1.bf16.msra.mxu1 %v3504_v20 }
  0x35   :  { %741 = vmatprep.subr.bf16.mxu0 %v3511_v21  ;;  %782 = vmatprep.subr.bf16.mxu1 %v3518_v22 }
  0x38   :  { %742 = vmatpush1.bf16.msra.mxu0 %v3525_v23  ;;  %783 = vmatpush1.bf16.msra.mxu1 %v3530_v24 }
  0x39   :  { %743 = vmatprep.subr.bf16.mxu0 %v3537_v25  ;;  %784 = vmatprep.subr.bf16.mxu1 %v3542_v26 }
  0x3c   :  { %744 = vmatpush1.bf16.msra.mxu0 %v3550_v28  ;;  %785 = vmatpush1.bf16.msra.mxu1 %v3555_v29 }
  0x3d   :  { %745 = vmatprep.subr.bf16.mxu0 %v3563_v31  ;;  %786 = vmatprep.subr.bf16.mxu1 %v3568_v32 }
  0x40   :  { %746 = vmatpush1.bf16.msra.mxu0 %v3580_v34  ;;  %787 = vmatpush1.bf16.msra.mxu1 %v3585_v35 }
  0x41   :  { %1045 = vmatprep.subr.bf16.mxu0 %v3391_v0  ;;  %1086 = vmatprep.subr.bf16.mxu1 %v3398_v2 }
  0x86   :  { %v43_v46 = vpop.permute.xlu0 %42 }
  0x87   :  { %v101_v47 = vmul.f32 %v3640_v43, %v43_v46  ;;  %v102_v49 = vmul.f32 %v3645_v45, %v43_v46  ;;  %v103_v63 = vmul.f32 %v3656_v55, %v43_v46 }
  0x89   :  { %v155_v52 = vadd.f32 %v3648_v48, %v101_v47  ;;  %v156_v53 = vadd.f32 %v3651_v50, %v102_v49  ;;  %v157_v47 = vadd.f32 %v3660_v27, %v103_v63  ;;  %v104_v49 = vmul.f32 %v3662_v37, %v43_v46 }
  0xe3   :  { %v452_v54 = vpop.f32.mrf.mxu0  ;;  %v493_v56 = vpop.f32.mrf.mxu1 }
  0xe4   :  { %v500_v57 = vadd.f32 %v452_v54, %v155_v52  ;;  %v3666_v52 = vrot.slane %v133_v44, %v95_v59 }
  0xe5   :  { %v454_v58 = vpop.f32.mrf.mxu0  ;;  %v495_v60 = vpop.f32.mrf.mxu1 }
  0xe6   :  { %v2873_v61 = vmul.f32 -1.442695, %v500_v57  ;;  %v501_v62 = vadd.f32 %v454_v58, %v156_v53  ;;  %v502_v53 = vadd.f32 %v493_v56, %v157_v47  ;;  %v158_v54 = vadd.f32 %v3666_v52, %v104_v49 }
  0xe7   :  { %v456_v30 = vpop.f32.mrf.mxu0  ;;  %v497_v33 = vpop.f32.mrf.mxu1 }
  0xe8   :  { %3222 = vpow2.f32 %v2873_v61  ;;  %v2874_v36 = vmul.f32 -1.442695, %v501_v62  ;;  %v2875_v51 = vmul.f32 -1.442695, %v502_v53  ;;  %v503_v58 = vadd.f32 %v495_v60, %v158_v54  ;;  %v33_v54 = vld [vmem:[%s4146_s0 + $0x10] sm:$0xff] }
  0xe9   :  { %v457_v40 = vpop.f32.mrf.mxu0  ;;  %v498_v42 = vpop.f32.mrf.mxu1  ;;  %52 = vperm.xlu1 %3125, %v33_v54  }
  0xea   :  { %3224 = vpow2.f32 %v2874_v36  ;;  %v3675_v42 = vld [vmem:[%s4149_s4] ss:$0 sm:$0xff] }
  0xeb   :  { %3226 = vpow2.f32 %v2875_v51  ;;  %v34_v51 = vld [vmem:[%s4146_s0 + $0x18] sm:$0xff] }
  0xed   :  { %57 = vperm.xlu1 %3125, %v34_v51  }
  0xf5   :  { %v3223_v57 = vpop.eup %3222 }
  0xf6   :  { %v513_v30 = vadd.f32 1.0, %v3223_v57  ;;  %v36_v57 = vld [vmem:[%s4146_s0 + $0x28] sm:$0xff] }
  0xf7   :  { %v3225_v61 = vpop.eup %3224  ;;  %67 = vperm.xlu1 %3125, %v36_v57  }
  0xf8   :  { %3228 = vrcp.f32 %v513_v30  ;;  %v514_v41 = vadd.f32 1.0, %v3225_v61  ;;  %v3227_v62 = vpop.eup %3226 }
  0xf9   :  { %3230 = vtanh.f32 %v503_v58  ;;  %v515_v46 = vadd.f32 1.0, %v3227_v62 }
  0xfa   :  { %3232 = vrcp.f32 %v514_v41 }
  0xfb   :  { %3234 = vrcp.f32 %v515_v46 }
 0x105   :  { %v3229_v33 = vpop.eup %3228 }
 0x106   :  { %v3231_v63 = vpop.eup %3230 }
 0x107   :  { %v3233_v36 = vpop.eup %3232  ;;  %v524_v59 = vmul.f32 %v3231_v63, %v3229_v33 }
 0x108   :  { %v523_v44 = vmul.f32 0.0, %v3233_v36  ;;  %v3235_v60 = vpop.eup %3234 }
 0x10a   :  { %v3669_v56 = vadd.f32 %v524_v59, %v523_v44 }
 0x10c   :  { %3236 = vtanh.f32 %v3669_v56 }
 0x119   :  { %v3237_v40 = vpop.eup %3236 }
 0x11a   :  { %v527_v47 = vmul.f32 %v3237_v40, %v3235_v60 }
 0x11c   :  { %v2744_v49 = vmul.f32 %v3675_v42, %v527_v47  ;;  %v538_v53 = vpack.c.bf16 %v527_v47, %v527_v47 }
 0x11e   :  { %2752 = vadd.xlane.f32.xlu0 %v2744_v49  ;;  %764 = vmatmul.mubr.bf16.vlgmr.msra.gmra.mxu0 %v538_v53 }
 0x11f   :  { %805 = vmatmul.mubr.bf16.vlgmr.msra.gmra.mxu1 %v538_v53  ;;  %1046 = vmatpush1.bf16.msra.mxu0 %v3406_v3 }
 0x120   :  { %1087 = vmatpush1.bf16.msra.mxu1 %v3411_v4  ;;  %1047 = vmatprep.subr.bf16.mxu0 %v3417_v5 }
 0x121   :  { %1088 = vmatprep.subr.bf16.mxu1 %v3424_v6  ;;  %1077 = vmatprep.mubr.bf16.mxu0 %v3351_v1 }
 0x122   :  { %1118 = vmatprep.mubr.bf16.mxu1 %v3351_v1 }
 0x123   :  { %1048 = vmatpush1.bf16.msra.mxu0 %v3429_v7 }
 0x124   :  { %1089 = vmatpush1.bf16.msra.mxu1 %v3435_v8  ;;  %1049 = vmatprep.subr.bf16.mxu0 %v3441_v9 }
 0x125   :  { %1090 = vmatprep.subr.bf16.mxu1 %v3446_v10 }
 0x127   :  { %1050 = vmatpush1.bf16.msra.mxu0 %v3451_v11 }
 0x128   :  { %1091 = vmatpush1.bf16.msra.mxu1 %v3456_v12  ;;  %1051 = vmatprep.subr.bf16.mxu0 %v3463_v13 }
 0x129   :  { %1092 = vmatprep.subr.bf16.mxu1 %v3470_v14 }
 0x12b   :  { %1052 = vmatpush1.bf16.msra.mxu0 %v3475_v15 }
 0x12c   :  { %1093 = vmatpush1.bf16.msra.mxu1 %v3482_v16  ;;  %1053 = vmatprep.subr.bf16.mxu0 %v3487_v17 }
 0x12d   :  { %1094 = vmatprep.subr.bf16.mxu1 %v3494_v18 }
 0x12f   :  { %1054 = vmatpush1.bf16.msra.mxu0 %v3499_v19 }
 0x130   :  { %1095 = vmatpush1.bf16.msra.mxu1 %v3504_v20  ;;  %1055 = vmatprep.subr.bf16.mxu0 %v3511_v21 }
 0x131   :  { %1096 = vmatprep.subr.bf16.mxu1 %v3518_v22 }
 0x133   :  { %1056 = vmatpush1.bf16.msra.mxu0 %v3525_v23 }
 0x134   :  { %1097 = vmatpush1.bf16.msra.mxu1 %v3530_v24  ;;  %1057 = vmatprep.subr.bf16.mxu0 %v3537_v25 }
 0x135   :  { %1098 = vmatprep.subr.bf16.mxu1 %v3542_v26 }
 0x137   :  { %1058 = vmatpush1.bf16.msra.mxu0 %v3550_v28 }
 0x138   :  { %1099 = vmatpush1.bf16.msra.mxu1 %v3555_v29  ;;  %1059 = vmatprep.subr.bf16.mxu0 %v3563_v31 }
 0x139   :  { %1100 = vmatprep.subr.bf16.mxu1 %v3568_v32 }
 0x13b   :  { %1060 = vmatpush1.bf16.msra.mxu0 %v3580_v34 }
 0x13c   :  { %1101 = vmatpush1.bf16.msra.mxu1 %v3585_v35  ;;  %1359 = vmatprep.subr.bf16.mxu0 %v3391_v0  ;;  %v38_v0 = vld [vmem:[%s4146_s0 + $0x38] sm:$0xff] }
 0x13d   :  { %1400 = vmatprep.subr.bf16.mxu1 %v3398_v2  ;;  %77 = vperm.xlu1 %3125, %v38_v0   ;;  %v48_v2 = vpop.permute.xlu0 %47 }
 0x13e   :  { %v105_v58 = vmul.f32 %v3640_v43, %v48_v2  ;;  %v106_v30 = vmul.f32 %v3645_v45, %v48_v2  ;;  %v107_v49 = vmul.f32 %v3656_v55, %v48_v2  ;;  %v108_v0 = vmul.f32 %v3662_v37, %v48_v2 }
 0x140   :  { %v159_v61 = vadd.f32 %v3648_v48, %v105_v58  ;;  %v160_v63 = vadd.f32 %v3651_v50, %v106_v30  ;;  %v161_v51 = vadd.f32 %v3660_v27, %v107_v49  ;;  %v162_v30 = vadd.f32 %v3666_v52, %v108_v0 }
 0x1de   :  { %v765_v41 = vpop.f32.mrf.mxu0 }
 0x1df   :  { %v813_v62 = vadd.f32 %v765_v41, %v159_v61  ;;  %v806_v33 = vpop.f32.mrf.mxu1 }
 0x1e0   :  { %v767_v36 = vpop.f32.mrf.mxu0  ;;  %v815_v57 = vadd.f32 %v806_v33, %v161_v51 }
 0x1e1   :  { %v2908_v46 = vmul.f32 -1.442695, %v813_v62  ;;  %v814_v44 = vadd.f32 %v767_v36, %v160_v63  ;;  %v808_v59 = vpop.f32.mrf.mxu1 }
 0x1e2   :  { %v769_v60 = vpop.f32.mrf.mxu0  ;;  %v2910_v58 = vmul.f32 -1.442695, %v815_v57  ;;  %v816_v41 = vadd.f32 %v808_v59, %v162_v30 }
 0x1e3   :  { %3238 = vpow2.f32 %v2908_v46  ;;  %v2909_v40 = vmul.f32 -1.442695, %v814_v44  ;;  %v810_v47 = vpop.f32.mrf.mxu1 }
 0x1e4   :  { %v770_v53 = vpop.f32.mrf.mxu0 }
 0x1e5   :  { %3240 = vpow2.f32 %v2909_v40  ;;  %v811_v54 = vpop.f32.mrf.mxu1 }
 0x1e6   :  { %3242 = vpow2.f32 %v2910_v58 }
 0x1f0   :  { %v3239_v61 = vpop.eup %3238 }
 0x1f1   :  { %v826_v62 = vadd.f32 1.0, %v3239_v61 }
 0x1f2   :  { %v3241_v63 = vpop.eup %3240 }
 0x1f3   :  { %3244 = vrcp.f32 %v826_v62  ;;  %v827_v36 = vadd.f32 1.0, %v3241_v63  ;;  %v3243_v46 = vpop.eup %3242 }
 0x1f4   :  { %3246 = vtanh.f32 %v816_v41  ;;  %v828_v47 = vadd.f32 1.0, %v3243_v46 }
 0x1f5   :  { %3248 = vrcp.f32 %v827_v36 }
 0x1f6   :  { %3250 = vrcp.f32 %v828_v47  ;;  %v3797_v47 = vld [vmem:[%s4145_s2 + $0xe0] ss:$16 sps:$4 sm:$0xff]  }
 0x200   :  { %v3245_v44 = vpop.eup %3244 }
 0x201   :  { %v3247_v60 = vpop.eup %3246 }
 0x202   :  { %v3249_v40 = vpop.eup %3248  ;;  %v837_v2 = vmul.f32 %v3247_v60, %v3245_v44  ;;  %v3787_v60 = vld [vmem:[%s4145_s2 + $0xe4] ss:$16 sps:$4 sm:$0xff]  }
 0x203   :  { %v836_v33 = vmul.f32 %v3249_v40, %v3669_v56  ;;  %v3251_v59 = vpop.eup %3250  ;;  %v3792_v40 = vld [vmem:[%s4145_s2 + $0xec] ss:$16 sps:$4 sm:$0xff]  }
 0x205   :  { %v3733_v49 = vadd.f32 %v837_v2, %v836_v33  ;;  %v3802_v33 = vld [vmem:[%s4145_s2 + $0xe8] ss:$16 sps:$4 sm:$0xff]   ;;  %v3811_v2 = vld [vmem:[%s4145_s2 + $0xc4] ss:$16 sps:$4 sm:$0xff]  }
 0x207   :  { %3252 = vtanh.f32 %v3733_v49 }
 0x214   :  { %v3253_v53 = vpop.eup %3252 }
 0x215   :  { %v840_v54 = vmul.f32 %v3253_v53, %v3251_v59  ;;  %v3821_v59 = vld [vmem:[%s4145_s2 + $0xc0] ss:$16 sps:$4 sm:$0xff]   ;;  %v3826_v53 = vld [vmem:[%s4145_s2 + $0xc8] ss:$16 sps:$4 sm:$0xff]  }
 0x217   :  { %v2745_v51 = vmul.f32 %v3675_v42, %v840_v54  ;;  %v852_v57 = vpack.c.bf16 %v840_v54, %v840_v54  ;;  %v3835_v54 = vld [vmem:[%s4145_s2 + $0xa4] ss:$16 sps:$4 sm:$0xff]  }
 0x219   :  { %2754 = vadd.xlane.f32.xlu1 %v2745_v51  ;;  %1078 = vmatmul.mubr.bf16.vlgmr.msra.gmra.mxu0 %v852_v57  ;;  %v3840_v51 = vld [vmem:[%s4145_s2 + $0xac] ss:$16 sps:$4 sm:$0xff]  }
 0x21a   :  { %1119 = vmatmul.mubr.bf16.vlgmr.msra.gmra.mxu1 %v852_v57  ;;  %1360 = vmatpush1.bf16.msra.mxu0 %v3406_v3  ;;  %v53_v3 = vpop.permute.xlu1 %52  ;;  %v3845_v57 = vld [vmem:[%s4145_s2 + $0xa0] ss:$16 sps:$4 sm:$0xff]  }
 0x21b   :  { %1401 = vmatpush1.bf16.msra.mxu1 %v3411_v4  ;;  %1361 = vmatprep.subr.bf16.mxu0 %v3417_v5  ;;  %v109_v4 = vmul.f32 %v3640_v43, %v53_v3  ;;  %v110_v5 = vmul.f32 %v3645_v45, %v53_v3 }
 0x21c   :  { %1402 = vmatprep.subr.bf16.mxu1 %v3424_v6  ;;  %1391 = vmatprep.mubr.bf16.mxu0 %v3351_v1 }
 0x21d   :  { %1432 = vmatprep.mubr.bf16.mxu1 %v3351_v1  ;;  %v163_v6 = vadd.f32 %v3648_v48, %v109_v4  ;;  %v3859_v4 = vld [vmem:[%s4145_s2 + $0x80] ss:$16 sps:$4 sm:$0xff]  }
 0x21e   :  { %1362 = vmatpush1.bf16.msra.mxu0 %v3429_v7  ;;  %v164_v7 = vadd.f32 %v3651_v50, %v110_v5  ;;  %v3864_v5 = vld [vmem:[%s4145_s2 + $0x84] ss:$16 sps:$4 sm:$0xff]  }
 0x21f   :  { %1403 = vmatpush1.bf16.msra.mxu1 %v3435_v8  ;;  %1363 = vmatprep.subr.bf16.mxu0 %v3441_v9 }
 0x220   :  { %1404 = vmatprep.subr.bf16.mxu1 %v3446_v10 }
 0x222   :  { %1364 = vmatpush1.bf16.msra.mxu0 %v3451_v11 }
 0x223   :  { %1405 = vmatpush1.bf16.msra.mxu1 %v3456_v12  ;;  %1365 = vmatprep.subr.bf16.mxu0 %v3463_v13 }
 0x224   :  { %1406 = vmatprep.subr.bf16.mxu1 %v3470_v14 }
 0x226   :  { %1366 = vmatpush1.bf16.msra.mxu0 %v3475_v15  ;;  %v111_v15 = vmul.f32 %v3656_v55, %v53_v3 }
 0x227   :  { %1407 = vmatpush1.bf16.msra.mxu1 %v3482_v16  ;;  %1367 = vmatprep.subr.bf16.mxu0 %v3487_v17 }
 0x228   :  { %1408 = vmatprep.subr.bf16.mxu1 %v3494_v18 }
 0x22a   :  { %1368 = vmatpush1.bf16.msra.mxu0 %v3499_v19 }
 0x22b   :  { %1409 = vmatpush1.bf16.msra.mxu1 %v3504_v20  ;;  %1369 = vmatprep.subr.bf16.mxu0 %v3511_v21  ;;  %v165_v21 = vadd.f32 %v3660_v27, %v111_v15  ;;  %v3922_v15 = vld [vmem:[%s4145_s2 + $0x48] ss:$16 sps:$4 sm:$0xff]  }
 0x22c   :  { %1410 = vmatprep.subr.bf16.mxu1 %v3518_v22  ;;  %v112_v22 = vmul.f32 %v3662_v37, %v53_v3  ;;  %v3850_v3 = vld [vmem:[%s4145_s2 + $0xa8] ss:$16 sps:$4 sm:$0xff]  }
 0x22e   :  { %1370 = vmatpush1.bf16.msra.mxu0 %v3525_v23 }
 0x22f   :  { %1411 = vmatpush1.bf16.msra.mxu1 %v3530_v24  ;;  %1371 = vmatprep.subr.bf16.mxu0 %v3537_v25  ;;  %v166_v24 = vadd.f32 %v3666_v52, %v112_v22  ;;  %v3965_v22 = vld [vmem:[%s4145_s2] ss:$16 sps:$4 sm:$0xff]  }
 0x230   :  { %1412 = vmatprep.subr.bf16.mxu1 %v3542_v26 }
 0x232   :  { %1372 = vmatpush1.bf16.msra.mxu0 %v3550_v28 }
 0x233   :  { %1413 = vmatpush1.bf16.msra.mxu1 %v3555_v29  ;;  %1373 = vmatprep.subr.bf16.mxu0 %v3563_v31 }
 0x234   :  { %1414 = vmatprep.subr.bf16.mxu1 %v3568_v32 }
 0x236   :  { %1374 = vmatpush1.bf16.msra.mxu0 %v3580_v34 }
 0x237   :  { %1415 = vmatpush1.bf16.msra.mxu1 %v3585_v35  ;;  %1673 = vmatprep.subr.bf16.mxu0 %v3787_v60 }
 0x238   :  { %1714 = vmatprep.subr.bf16.mxu1 %v3792_v40 }
 0x2d9   :  { %v1079_v8 = vpop.f32.mrf.mxu0 }
 0x2da   :  { %v1127_v9 = vadd.f32 %v1079_v8, %v163_v6  ;;  %v1120_v10 = vpop.f32.mrf.mxu1  ;;  %v3869_v6 = vld [vmem:[%s4145_s2 + $0x88] ss:$16 sps:$4 sm:$0xff]   ;;  %v3879_v8 = vld [vmem:[%s4145_s2 + $0x64] ss:$16 sps:$4 sm:$0xff]  }
 0x2db   :  { %v1081_v11 = vpop.f32.mrf.mxu0  ;;  %v1129_v23 = vadd.f32 %v1120_v10, %v165_v21  ;;  %v3893_v10 = vld [vmem:[%s4145_s2 + $0x60] ss:$16 sps:$4 sm:$0xff]   ;;  %v3958_v21 = vld [vmem:[%s4145_s2 + $0xc] ss:$16 sps:$4 sm:$0xff]  }
 0x2dc   :  { %v2943_v12 = vmul.f32 -1.442695, %v1127_v9  ;;  %v1128_v13 = vadd.f32 %v1081_v11, %v164_v7  ;;  %v1122_v14 = vpop.f32.mrf.mxu1  ;;  %v3874_v7 = vld [vmem:[%s4145_s2 + $0x8c] ss:$16 sps:$4 sm:$0xff]   ;;  %v3898_v11 = vld [vmem:[%s4145_s2 + $0x68] ss:$16 sps:$4 sm:$0xff]  }
 0x2dd   :  { %v1083_v16 = vpop.f32.mrf.mxu0  ;;  %v2945_v25 = vmul.f32 -1.442695, %v1129_v23  ;;  %v1130_v28 = vadd.f32 %v1122_v14, %v166_v24  ;;  %v3885_v9 = vld [vmem:[%s4145_s2 + $0x6c] ss:$16 sps:$4 sm:$0xff]   ;;  %v3917_v14 = vld [vmem:[%s4145_s2 + $0x40] ss:$16 sps:$4 sm:$0xff]   ;;  %v58_v24 = vpop.permute.xlu1 %57 }
 0x2de   :  { %3254 = vpow2.f32 %v2943_v12  ;;  %v2944_v17 = vmul.f32 -1.442695, %v1128_v13  ;;  %v1124_v18 = vpop.f32.mrf.mxu1  ;;  %v3905_v12 = vld [vmem:[%s4145_s2 + $0x44] ss:$16 sps:$4 sm:$0xff]   ;;  %v3910_v13 = vld [vmem:[%s4145_s2 + $0x4c] ss:$16 sps:$4 sm:$0xff]  }
 0x2df   :  { %v1084_v19 = vpop.f32.mrf.mxu0  ;;  %v3929_v16 = vld [vmem:[%s4145_s2 + $0x24] ss:$16 sps:$4 sm:$0xff]   ;;  %v3941_v18 = vld [vmem:[%s4145_s2 + $0x20] ss:$16 sps:$4 sm:$0xff]   ;;  %v3970_v23 = vld [vmem:[%s4145_s2 + $0x8] ss:$16 sps:$4 sm:$0xff]  }
 0x2e0   :  { %3256 = vpow2.f32 %v2944_v17  ;;  %v1125_v20 = vpop.f32.mrf.mxu1  ;;  %v3934_v17 = vld [vmem:[%s4145_s2 + $0x2c] ss:$16 sps:$4 sm:$0xff]   ;;  %v3946_v19 = vld [vmem:[%s4145_s2 + $0x28] ss:$16 sps:$4 sm:$0xff]  }
 0x2e1   :  { %3258 = vpow2.f32 %v2945_v25  ;;  %v3953_v20 = vld [vmem:[%s4145_s2 + $0x4] ss:$16 sps:$4 sm:$0xff]   ;;  %v113_v25 = vmul.f32 %v3640_v43, %v58_v24 }
 0x2eb   :  { %v3255_v26 = vpop.eup %3254 }
 0x2ec   :  { %v1140_v29 = vadd.f32 1.0, %v3255_v26  ;;  %v114_v26 = vmul.f32 %v3645_v45, %v58_v24 }
 0x2ed   :  { %v3257_v31 = vpop.eup %3256 }
 0x2ee   :  { %3260 = vrcp.f32 %v1140_v29  ;;  %v1141_v32 = vadd.f32 1.0, %v3257_v31  ;;  %v3259_v34 = vpop.eup %3258 }
 0x2ef   :  { %3262 = vtanh.f32 %v1130_v28  ;;  %v1142_v58 = vadd.f32 1.0, %v3259_v34  ;;  %v167_v28 = vadd.f32 %v3648_v48, %v113_v25  ;;  %v168_v34 = vadd.f32 %v3651_v50, %v114_v26 }
 0x2f0   :  { %3264 = vrcp.f32 %v1141_v32 }
 0x2f1   :  { %3266 = vrcp.f32 %v1142_v58 }
 0x2fb   :  { %v3261_v35 = vpop.eup %3260 }
 0x2fc   :  { %v3263_v56 = vpop.eup %3262 }
 0x2fd   :  { %v3265_v0 = vpop.eup %3264  ;;  %v1151_v61 = vmul.f32 %v3263_v56, %v3261_v35 }
 0x2fe   :  { %v1150_v30 = vmul.f32 %v3265_v0, %v3733_v49  ;;  %v3267_v62 = vpop.eup %3266  ;;  %v3816_v49 = vld [vmem:[%s4145_s2 + $0xcc] ss:$16 sps:$4 sm:$0xff]  }
 0x300   :  { %v3778_v41 = vadd.f32 %v1151_v61, %v1150_v30 }
 0x302   :  { %3268 = vtanh.f32 %v3778_v41 }
 0x30f   :  { %v3269_v63 = vpop.eup %3268 }
 0x310   :  { %v1154_v36 = vmul.f32 %v3269_v63, %v3267_v62  ;;  %v115_v63 = vmul.f32 %v3656_v55, %v58_v24 }
 0x312   :  { %v2746_v46 = vmul.f32 %v3675_v42, %v1154_v36  ;;  %v1166_v44 = vpack.c.bf16 %v1154_v36, %v1154_v36 }
 0x314   :  { %2756 = vadd.xlane.f32.xlu0 %v2746_v46  ;;  %1392 = vmatmul.mubr.bf16.vlgmr.msra.gmra.mxu0 %v1166_v44 }
 0x315   :  { %1433 = vmatmul.mubr.bf16.vlgmr.msra.gmra.mxu1 %v1166_v44  ;;  %1705 = vmatprep.mubr.bf16.mxu0 %v3351_v1  ;;  %v169_v44 = vadd.f32 %v3660_v27, %v115_v63 }
 0x316   :  { %1746 = vmatprep.mubr.bf16.mxu1 %v3351_v1  ;;  %1674 = vmatpush1.bf16.msra.mxu0 %v3797_v47 }
 0x317   :  { %1715 = vmatpush1.bf16.msra.mxu1 %v3802_v33  ;;  %1675 = vmatprep.subr.bf16.mxu0 %v3811_v2 }
 0x318   :  { %1716 = vmatprep.subr.bf16.mxu1 %v3816_v49 }
 0x31a   :  { %1676 = vmatpush1.bf16.msra.mxu0 %v3821_v59 }
 0x31b   :  { %1717 = vmatpush1.bf16.msra.mxu1 %v3826_v53  ;;  %1677 = vmatprep.subr.bf16.mxu0 %v3835_v54 }
 0x31c   :  { %1718 = vmatprep.subr.bf16.mxu1 %v3840_v51 }
 0x31e   :  { %1678 = vmatpush1.bf16.msra.mxu0 %v3845_v57 }
 0x31f   :  { %1719 = vmatpush1.bf16.msra.mxu1 %v3850_v3  ;;  %1679 = vmatprep.subr.bf16.mxu0 %v3864_v5 }
 0x320   :  { %1720 = vmatprep.subr.bf16.mxu1 %v3874_v7 }
 0x322   :  { %1680 = vmatpush1.bf16.msra.mxu0 %v3859_v4 }
 0x323   :  { %1721 = vmatpush1.bf16.msra.mxu1 %v3869_v6  ;;  %1681 = vmatprep.subr.bf16.mxu0 %v3879_v8 }
 0x324   :  { %1722 = vmatprep.subr.bf16.mxu1 %v3885_v9 }
 0x326   :  { %1682 = vmatpush1.bf16.msra.mxu0 %v3893_v10 }
 0x327   :  { %1723 = vmatpush1.bf16.msra.mxu1 %v3898_v11  ;;  %1683 = vmatprep.subr.bf16.mxu0 %v3905_v12 }
 0x328   :  { %1724 = vmatprep.subr.bf16.mxu1 %v3910_v13 }
 0x32a   :  { %1684 = vmatpush1.bf16.msra.mxu0 %v3917_v14 }
 0x32b   :  { %1725 = vmatpush1.bf16.msra.mxu1 %v3922_v15  ;;  %1685 = vmatprep.subr.bf16.mxu0 %v3929_v16 }
 0x32c   :  { %1726 = vmatprep.subr.bf16.mxu1 %v3934_v17 }
 0x32e   :  { %1686 = vmatpush1.bf16.msra.mxu0 %v3941_v18 }
 0x32f   :  { %1727 = vmatpush1.bf16.msra.mxu1 %v3946_v19  ;;  %1687 = vmatprep.subr.bf16.mxu0 %v3953_v20 }
 0x330   :  { %1728 = vmatprep.subr.bf16.mxu1 %v3958_v21 }
 0x332   :  { %1688 = vmatpush1.bf16.msra.mxu0 %v3965_v22 }
 0x333   :  { %1729 = vmatpush1.bf16.msra.mxu1 %v3970_v23  ;;  %1987 = vmatprep.subr.bf16.mxu0 %v3787_v60 }
 0x334   :  { %2028 = vmatprep.subr.bf16.mxu1 %v3792_v40 }
 0x3d4   :  { %v1393_v29 = vpop.f32.mrf.mxu0 }
 0x3d5   :  { %v1441_v31 = vadd.f32 %v1393_v29, %v167_v28  ;;  %v1434_v32 = vpop.f32.mrf.mxu1  ;;  %v116_v28 = vmul.f32 %v3662_v37, %v58_v24 }
 0x3d6   :  { %v1395_v35 = vpop.f32.mrf.mxu0  ;;  %v1443_v25 = vadd.f32 %v1434_v32, %v169_v44 }
 0x3d7   :  { %v2978_v56 = vmul.f32 -1.442695, %v1441_v31  ;;  %v1442_v0 = vadd.f32 %v1395_v35, %v168_v34  ;;  %v1436_v58 = vpop.f32.mrf.mxu1  ;;  %v170_v26 = vadd.f32 %v3666_v52, %v116_v28 }
 0x3d8   :  { %v1397_v30 = vpop.f32.mrf.mxu0  ;;  %v2980_v29 = vmul.f32 -1.442695, %v1443_v25 }
 0x3d9   :  { %3270 = vpow2.f32 %v2978_v56  ;;  %v2979_v61 = vmul.f32 -1.442695, %v1442_v0  ;;  %v1438_v62 = vpop.f32.mrf.mxu1  ;;  %v1444_v34 = vadd.f32 %v1436_v58, %v170_v26 }
 0x3da   :  { %v1398_v36 = vpop.f32.mrf.mxu0 }
 0x3db   :  { %3272 = vpow2.f32 %v2979_v61  ;;  %v1439_v46 = vpop.f32.mrf.mxu1 }
 0x3dc   :  { %3274 = vpow2.f32 %v2980_v29 }
 0x3e6   :  { %v3271_v31 = vpop.eup %3270 }
 0x3e7   :  { %v1454_v35 = vadd.f32 1.0, %v3271_v31 }
 0x3e8   :  { %v3273_v30 = vpop.eup %3272 }
 0x3e9   :  { %3276 = vrcp.f32 %v1454_v35  ;;  %v1455_v56 = vadd.f32 1.0, %v3273_v30  ;;  %v3275_v0 = vpop.eup %3274 }
 0x3ea   :  { %3278 = vtanh.f32 %v1444_v34  ;;  %v1456_v63 = vadd.f32 1.0, %v3275_v0 }
 0x3eb   :  { %3280 = vrcp.f32 %v1455_v56 }
 0x3ec   :  { %3282 = vrcp.f32 %v1456_v63 }
 0x3f6   :  { %v3277_v61 = vpop.eup %3276 }
 0x3f7   :  { %v3279_v62 = vpop.eup %3278 }
 0x3f8   :  { %v3281_v36 = vpop.eup %3280  ;;  %v1465_v24 = vmul.f32 %v3279_v62, %v3277_v61 }
 0x3f9   :  { %v1464_v32 = vmul.f32 %v3281_v36, %v3778_v41  ;;  %v3283_v58 = vpop.eup %3282  ;;  %v63_v41 = vpop.permute.xlu0 %62 }
 0x3fa   :  { %v117_v26 = vmul.f32 %v3640_v43, %v63_v41  ;;  %v118_v31 = vmul.f32 %v3645_v45, %v63_v41 }
 0x3fb   :  { %v3987_v46 = vadd.f32 %v1465_v24, %v1464_v32 }
 0x3fc   :  { %v171_v34 = vadd.f32 %v3648_v48, %v117_v26  ;;  %v172_v0 = vadd.f32 %v3651_v50, %v118_v31 }
 0x3fd   :  { %3284 = vtanh.f32 %v3987_v46 }
 0x40a   :  { %v3285_v44 = vpop.eup %3284 }
 0x40b   :  { %v1468_v25 = vmul.f32 %v3285_v44, %v3283_v58  ;;  %v119_v44 = vmul.f32 %v3656_v55, %v63_v41 }
 0x40d   :  { %v2747_v28 = vmul.f32 %v3675_v42, %v1468_v25  ;;  %v1480_v29 = vpack.c.bf16 %v1468_v25, %v1468_v25 }
 0x40f   :  { %2758 = vadd.xlane.f32.xlu0 %v2747_v28  ;;  %1706 = vmatmul.mubr.bf16.vlgmr.msra.gmra.mxu0 %v1480_v29 }
 0x410   :  { %1747 = vmatmul.mubr.bf16.vlgmr.msra.gmra.mxu1 %v1480_v29  ;;  %1988 = vmatpush1.bf16.msra.mxu0 %v3797_v47  ;;  %v173_v29 = vadd.f32 %v3660_v27, %v119_v44 }
 0x411   :  { %2029 = vmatpush1.bf16.msra.mxu1 %v3802_v33  ;;  %1989 = vmatprep.subr.bf16.mxu0 %v3811_v2 }
 0x412   :  { %2030 = vmatprep.subr.bf16.mxu1 %v3816_v49  ;;  %2019 = vmatprep.mubr.bf16.mxu0 %v3351_v1 }
 0x413   :  { %2060 = vmatprep.mubr.bf16.mxu1 %v3351_v1 }
 0x414   :  { %1990 = vmatpush1.bf16.msra.mxu0 %v3821_v59 }
 0x415   :  { %2031 = vmatpush1.bf16.msra.mxu1 %v3826_v53  ;;  %1991 = vmatprep.subr.bf16.mxu0 %v3835_v54 }
 0x416   :  { %2032 = vmatprep.subr.bf16.mxu1 %v3840_v51 }
 0x418   :  { %1992 = vmatpush1.bf16.msra.mxu0 %v3845_v57 }
 0x419   :  { %2033 = vmatpush1.bf16.msra.mxu1 %v3850_v3  ;;  %1993 = vmatprep.subr.bf16.mxu0 %v3864_v5 }
 0x41a   :  { %2034 = vmatprep.subr.bf16.mxu1 %v3874_v7 }
 0x41c   :  { %1994 = vmatpush1.bf16.msra.mxu0 %v3859_v4 }
 0x41d   :  { %2035 = vmatpush1.bf16.msra.mxu1 %v3869_v6  ;;  %1995 = vmatprep.subr.bf16.mxu0 %v3879_v8 }
 0x41e   :  { %2036 = vmatprep.subr.bf16.mxu1 %v3885_v9 }
 0x420   :  { %1996 = vmatpush1.bf16.msra.mxu0 %v3893_v10 }
 0x421   :  { %2037 = vmatpush1.bf16.msra.mxu1 %v3898_v11  ;;  %1997 = vmatprep.subr.bf16.mxu0 %v3905_v12 }
 0x422   :  { %2038 = vmatprep.subr.bf16.mxu1 %v3910_v13 }
 0x424   :  { %1998 = vmatpush1.bf16.msra.mxu0 %v3917_v14 }
 0x425   :  { %2039 = vmatpush1.bf16.msra.mxu1 %v3922_v15  ;;  %1999 = vmatprep.subr.bf16.mxu0 %v3929_v16 }
 0x426   :  { %2040 = vmatprep.subr.bf16.mxu1 %v3934_v17 }
 0x428   :  { %2000 = vmatpush1.bf16.msra.mxu0 %v3941_v18 }
 0x429   :  { %2041 = vmatpush1.bf16.msra.mxu1 %v3946_v19  ;;  %2001 = vmatprep.subr.bf16.mxu0 %v3953_v20 }
 0x42a   :  { %2042 = vmatprep.subr.bf16.mxu1 %v3958_v21 }
 0x42c   :  { %2002 = vmatpush1.bf16.msra.mxu0 %v3965_v22 }
 0x42d   :  { %2043 = vmatpush1.bf16.msra.mxu1 %v3970_v23  ;;  %2301 = vmatprep.subr.bf16.mxu0 %v3787_v60 }
 0x42e   :  { %2342 = vmatprep.subr.bf16.mxu1 %v3792_v40 }
 0x4cf   :  { %v1707_v35 = vpop.f32.mrf.mxu0 }
 0x4d0   :  { %v1755_v30 = vadd.f32 %v1707_v35, %v171_v34  ;;  %v1748_v56 = vpop.f32.mrf.mxu1  ;;  %v120_v34 = vmul.f32 %v3662_v37, %v63_v41 }
 0x4d1   :  { %v1709_v61 = vpop.f32.mrf.mxu0  ;;  %v1757_v26 = vadd.f32 %v1748_v56, %v173_v29 }
 0x4d2   :  { %v3013_v62 = vmul.f32 -1.442695, %v1755_v30  ;;  %v1756_v36 = vadd.f32 %v1709_v61, %v172_v0  ;;  %v1750_v63 = vpop.f32.mrf.mxu1  ;;  %v174_v31 = vadd.f32 %v3666_v52, %v120_v34 }
 0x4d3   :  { %v1711_v32 = vpop.f32.mrf.mxu0  ;;  %v3015_v35 = vmul.f32 -1.442695, %v1757_v26 }
 0x4d4   :  { %3286 = vpow2.f32 %v3013_v62  ;;  %v3014_v24 = vmul.f32 -1.442695, %v1756_v36  ;;  %v1752_v58 = vpop.f32.mrf.mxu1  ;;  %v1758_v0 = vadd.f32 %v1750_v63, %v174_v31 }
 0x4d5   :  { %v1712_v25 = vpop.f32.mrf.mxu0 }
 0x4d6   :  { %3288 = vpow2.f32 %v3014_v24  ;;  %v1753_v28 = vpop.f32.mrf.mxu1 }
 0x4d7   :  { %3290 = vpow2.f32 %v3015_v35 }
 0x4e1   :  { %v3287_v30 = vpop.eup %3286 }
 0x4e2   :  { %v1768_v61 = vadd.f32 1.0, %v3287_v30 }
 0x4e3   :  { %v3289_v32 = vpop.eup %3288 }
 0x4e4   :  { %3292 = vrcp.f32 %v1768_v61  ;;  %v1769_v62 = vadd.f32 1.0, %v3289_v32  ;;  %v3291_v36 = vpop.eup %3290 }
 0x4e5   :  { %3294 = vtanh.f32 %v1758_v0  ;;  %v1770_v44 = vadd.f32 1.0, %v3291_v36 }
 0x4e6   :  { %3296 = vrcp.f32 %v1769_v62 }
 0x4e7   :  { %3298 = vrcp.f32 %v1770_v44 }
 0x4f1   :  { %v3293_v24 = vpop.eup %3292 }
 0x4f2   :  { %v3295_v58 = vpop.eup %3294 }
 0x4f3   :  { %v3297_v25 = vpop.eup %3296  ;;  %v1779_v41 = vmul.f32 %v3295_v58, %v3293_v24 }
 0x4f4   :  { %v1778_v56 = vmul.f32 %v3297_v25, %v3987_v46  ;;  %v3299_v63 = vpop.eup %3298  ;;  %v68_v46 = vpop.permute.xlu1 %67 }
 0x4f5   :  { %v121_v31 = vmul.f32 %v3640_v43, %v68_v46  ;;  %v122_v30 = vmul.f32 %v3645_v45, %v68_v46 }
 0x4f6   :  { %v4034_v28 = vadd.f32 %v1779_v41, %v1778_v56  ;;  %v123_v41 = vmul.f32 %v3656_v55, %v68_v46 }
 0x4f7   :  { %v175_v0 = vadd.f32 %v3648_v48, %v121_v31  ;;  %v176_v36 = vadd.f32 %v3651_v50, %v122_v30 }
 0x4f8   :  { %3300 = vtanh.f32 %v4034_v28 }
 0x505   :  { %v3301_v29 = vpop.eup %3300 }
 0x506   :  { %v1782_v26 = vmul.f32 %v3301_v29, %v3299_v63 }
 0x508   :  { %v2748_v34 = vmul.f32 %v3675_v42, %v1782_v26  ;;  %v1794_v35 = vpack.c.bf16 %v1782_v26, %v1782_v26  ;;  %v177_v26 = vadd.f32 %v3660_v27, %v123_v41 }
 0x50a   :  { %2760 = vadd.xlane.f32.xlu1 %v2748_v34  ;;  %2020 = vmatmul.mubr.bf16.vlgmr.msra.gmra.mxu0 %v1794_v35 }
 0x50b   :  { %2061 = vmatmul.mubr.bf16.vlgmr.msra.gmra.mxu1 %v1794_v35  ;;  %2302 = vmatpush1.bf16.msra.mxu0 %v3797_v47  ;;  %v124_v35 = vmul.f32 %v3662_v37, %v68_v46 }
 0x50c   :  { %2343 = vmatpush1.bf16.msra.mxu1 %v3802_v33  ;;  %2303 = vmatprep.subr.bf16.mxu0 %v3811_v2 }
 0x50d   :  { %2344 = vmatprep.subr.bf16.mxu1 %v3816_v49  ;;  %2333 = vmatprep.mubr.bf16.mxu0 %v3351_v1  ;;  %v178_v30 = vadd.f32 %v3666_v52, %v124_v35 }
 0x50e   :  { %2374 = vmatprep.mubr.bf16.mxu1 %v3351_v1 }
 0x50f   :  { %2304 = vmatpush1.bf16.msra.mxu0 %v3821_v59 }
 0x510   :  { %2345 = vmatpush1.bf16.msra.mxu1 %v3826_v53  ;;  %2305 = vmatprep.subr.bf16.mxu0 %v3835_v54 }
 0x511   :  { %2346 = vmatprep.subr.bf16.mxu1 %v3840_v51 }
 0x513   :  { %2306 = vmatpush1.bf16.msra.mxu0 %v3845_v57 }
 0x514   :  { %2347 = vmatpush1.bf16.msra.mxu1 %v3850_v3  ;;  %2307 = vmatprep.subr.bf16.mxu0 %v3864_v5 }
 0x515   :  { %2348 = vmatprep.subr.bf16.mxu1 %v3874_v7 }
 0x517   :  { %2308 = vmatpush1.bf16.msra.mxu0 %v3859_v4 }
 0x518   :  { %2349 = vmatpush1.bf16.msra.mxu1 %v3869_v6  ;;  %2309 = vmatprep.subr.bf16.mxu0 %v3879_v8 }
 0x519   :  { %2350 = vmatprep.subr.bf16.mxu1 %v3885_v9 }
 0x51b   :  { %2310 = vmatpush1.bf16.msra.mxu0 %v3893_v10 }
 0x51c   :  { %2351 = vmatpush1.bf16.msra.mxu1 %v3898_v11  ;;  %2311 = vmatprep.subr.bf16.mxu0 %v3905_v12 }
 0x51d   :  { %2352 = vmatprep.subr.bf16.mxu1 %v3910_v13 }
 0x51f   :  { %2312 = vmatpush1.bf16.msra.mxu0 %v3917_v14 }
 0x520   :  { %2353 = vmatpush1.bf16.msra.mxu1 %v3922_v15  ;;  %2313 = vmatprep.subr.bf16.mxu0 %v3929_v16 }
 0x521   :  { %2354 = vmatprep.subr.bf16.mxu1 %v3934_v17 }
 0x523   :  { %2314 = vmatpush1.bf16.msra.mxu0 %v3941_v18 }
 0x524   :  { %2355 = vmatpush1.bf16.msra.mxu1 %v3946_v19  ;;  %2315 = vmatprep.subr.bf16.mxu0 %v3953_v20 }
 0x525   :  { %2356 = vmatprep.subr.bf16.mxu1 %v3958_v21 }
 0x527   :  { %2316 = vmatpush1.bf16.msra.mxu0 %v3965_v22 }
 0x528   :  { %2357 = vmatpush1.bf16.msra.mxu1 %v3970_v23  ;;  %2615 = vmatprep.subr.bf16.mxu0 %v3787_v60 }
 0x529   :  { %2656 = vmatprep.subr.bf16.mxu1 %v3792_v40 }
 0x5ca   :  { %v2021_v61 = vpop.f32.mrf.mxu0 }
 0x5cb   :  { %v2069_v32 = vadd.f32 %v2021_v61, %v175_v0  ;;  %v2062_v62 = vpop.f32.mrf.mxu1 }
 0x5cc   :  { %v2023_v24 = vpop.f32.mrf.mxu0  ;;  %v2071_v34 = vadd.f32 %v2062_v62, %v177_v26 }
 0x5cd   :  { %v3048_v58 = vmul.f32 -1.442695, %v2069_v32  ;;  %v2070_v25 = vadd.f32 %v2023_v24, %v176_v36  ;;  %v2064_v44 = vpop.f32.mrf.mxu1 }
 0x5ce   :  { %v2025_v56 = vpop.f32.mrf.mxu0  ;;  %v3050_v31 = vmul.f32 -1.442695, %v2071_v34  ;;  %v2072_v61 = vadd.f32 %v2064_v44, %v178_v30 }
 0x5cf   :  { %3302 = vpow2.f32 %v3048_v58  ;;  %v3049_v60 = vmul.f32 -1.442695, %v2070_v25  ;;  %v2066_v40 = vpop.f32.mrf.mxu1 }
 0x5d0   :  { %v2026_v63 = vpop.f32.mrf.mxu0 }
 0x5d1   :  { %3304 = vpow2.f32 %v3049_v60  ;;  %v2067_v29 = vpop.f32.mrf.mxu1 }
 0x5d2   :  { %3306 = vpow2.f32 %v3050_v31 }
 0x5dc   :  { %v3303_v0 = vpop.eup %3302 }
 0x5dd   :  { %v2082_v32 = vadd.f32 1.0, %v3303_v0 }
 0x5de   :  { %v3305_v36 = vpop.eup %3304 }
 0x5df   :  { %3308 = vrcp.f32 %v2082_v32  ;;  %v2083_v24 = vadd.f32 1.0, %v3305_v36  ;;  %v3307_v58 = vpop.eup %3306  ;;  %v3350_v36 = vld [vmem:[%s4149_s4] ss:$0 sm:$0xff] }
 0x5e0   :  { %3310 = vtanh.f32 %v2072_v61  ;;  %v2084_v40 = vadd.f32 1.0, %v3307_v58 }
 0x5e1   :  { %3312 = vrcp.f32 %v2083_v24 }
 0x5e2   :  { %3314 = vrcp.f32 %v2084_v40 }
 0x5ec   :  { %v3309_v25 = vpop.eup %3308 }
 0x5ed   :  { %v3311_v56 = vpop.eup %3310 }
 0x5ee   :  { %v3313_v60 = vpop.eup %3312  ;;  %v2093_v46 = vmul.f32 %v3311_v56, %v3309_v25  ;;  %v78_v25 = vpop.permute.xlu1 %77 }
 0x5ef   :  { %v2092_v62 = vmul.f32 %v3313_v60, %v4034_v28  ;;  %v3315_v44 = vpop.eup %3314  ;;  %v129_v56 = vmul.f32 %v3640_v43, %v78_v25  ;;  %v130_v60 = vmul.f32 %v3645_v45, %v78_v25 }
 0x5f1   :  { %v4081_v41 = vadd.f32 %v2093_v46, %v2092_v62  ;;  %v183_v40 = vadd.f32 %v3648_v48, %v129_v56 }
 0x5f3   :  { %3316 = vtanh.f32 %v4081_v41 }
 0x600   :  { %v3317_v63 = vpop.eup %3316 }
 0x601   :  { %v2096_v29 = vmul.f32 %v3317_v63, %v3315_v44  ;;  %v184_v44 = vadd.f32 %v3651_v50, %v130_v60 }
 0x603   :  { %v2749_v26 = vmul.f32 %v3675_v42, %v2096_v29  ;;  %v2108_v34 = vpack.c.bf16 %v2096_v29, %v2096_v29 }
 0x605   :  { %2762 = vadd.xlane.f32.xlu0 %v2749_v26  ;;  %2334 = vmatmul.mubr.bf16.vlgmr.msra.gmra.mxu0 %v2108_v34 }
 0x606   :  { %2375 = vmatmul.mubr.bf16.vlgmr.msra.gmra.mxu1 %v2108_v34  ;;  %2616 = vmatpush1.bf16.msra.mxu0 %v3797_v47 }
 0x607   :  { %2657 = vmatpush1.bf16.msra.mxu1 %v3802_v33  ;;  %2617 = vmatprep.subr.bf16.mxu0 %v3811_v2 }
 0x608   :  { %2658 = vmatprep.subr.bf16.mxu1 %v3816_v49  ;;  %2647 = vmatprep.mubr.bf16.mxu0 %v3351_v1 }
 0x609   :  { %2688 = vmatprep.mubr.bf16.mxu1 %v3351_v1  ;;  %v73_v1 = vpop.permute.xlu0 %72 }
 0x60a   :  { %2618 = vmatpush1.bf16.msra.mxu0 %v3821_v59  ;;  %v125_v42 = vmul.f32 %v3640_v43, %v73_v1  ;;  %v126_v47 = vmul.f32 %v3645_v45, %v73_v1 }
 0x60b   :  { %2659 = vmatpush1.bf16.msra.mxu1 %v3826_v53  ;;  %2619 = vmatprep.subr.bf16.mxu0 %v3835_v54 }
 0x60c   :  { %2660 = vmatprep.subr.bf16.mxu1 %v3840_v51  ;;  %v179_v33 = vadd.f32 %v3648_v48, %v125_v42  ;;  %v180_v53 = vadd.f32 %v3651_v50, %v126_v47 }
 0x60e   :  { %2620 = vmatpush1.bf16.msra.mxu0 %v3845_v57 }
 0x60f   :  { %2661 = vmatpush1.bf16.msra.mxu1 %v3850_v3  ;;  %2621 = vmatprep.subr.bf16.mxu0 %v3864_v5 }
 0x610   :  { %2662 = vmatprep.subr.bf16.mxu1 %v3874_v7  ;;  %v127_v7 = vmul.f32 %v3656_v55, %v73_v1 }
 0x612   :  { %2622 = vmatpush1.bf16.msra.mxu0 %v3859_v4 }
 0x613   :  { %2663 = vmatpush1.bf16.msra.mxu1 %v3869_v6  ;;  %2623 = vmatprep.subr.bf16.mxu0 %v3879_v8 }
 0x614   :  { %2664 = vmatprep.subr.bf16.mxu1 %v3885_v9 }
 0x616   :  { %2624 = vmatpush1.bf16.msra.mxu0 %v3893_v10  ;;  %v181_v10 = vadd.f32 %v3660_v27, %v127_v7 }
 0x617   :  { %2665 = vmatpush1.bf16.msra.mxu1 %v3898_v11  ;;  %2625 = vmatprep.subr.bf16.mxu0 %v3905_v12  ;;  %v128_v12 = vmul.f32 %v3662_v37, %v73_v1 }
 0x618   :  { %2666 = vmatprep.subr.bf16.mxu1 %v3910_v13 }
 0x61a   :  { %2626 = vmatpush1.bf16.msra.mxu0 %v3917_v14  ;;  %v182_v14 = vadd.f32 %v3666_v52, %v128_v12  ;;  %v2753_v12 = vpop.xlane.xlu0 %2752 }
 0x61b   :  { %2667 = vmatpush1.bf16.msra.mxu1 %v3922_v15  ;;  %2627 = vmatprep.subr.bf16.mxu0 %v3929_v16 }
 0x61c   :  { %2668 = vmatprep.subr.bf16.mxu1 %v3934_v17 }
 0x61e   :  { %2628 = vmatpush1.bf16.msra.mxu0 %v3941_v18 }
 0x61f   :  { %2669 = vmatpush1.bf16.msra.mxu1 %v3946_v19  ;;  %2629 = vmatprep.subr.bf16.mxu0 %v3953_v20 }
 0x620   :  { %2670 = vmatprep.subr.bf16.mxu1 %v3958_v21 }
 0x622   :  { %2630 = vmatpush1.bf16.msra.mxu0 %v3965_v22 }
 0x623   :  { %2671 = vmatpush1.bf16.msra.mxu1 %v3970_v23 }
 0x6c5   :  { %v2335_v2 = vpop.f32.mrf.mxu0 }
 0x6c6   :  { %v2383_v49 = vadd.f32 %v2335_v2, %v179_v33  ;;  %v2376_v59 = vpop.f32.mrf.mxu1  ;;  %v131_v33 = vmul.f32 %v3656_v55, %v78_v25 }
 0x6c7   :  { %v2337_v54 = vpop.f32.mrf.mxu0  ;;  %v2385_v11 = vadd.f32 %v2376_v59, %v181_v10 }
 0x6c8   :  { %v3083_v51 = vmul.f32 -1.442695, %v2383_v49  ;;  %v2384_v57 = vadd.f32 %v2337_v54, %v180_v53  ;;  %v2378_v3 = vpop.f32.mrf.mxu1  ;;  %v185_v48 = vadd.f32 %v3660_v27, %v131_v33  ;;  %v132_v49 = vmul.f32 %v3662_v37, %v78_v25 }
 0x6c9   :  { %v2339_v4 = vpop.f32.mrf.mxu0  ;;  %v3085_v13 = vmul.f32 -1.442695, %v2385_v11  ;;  %v2386_v16 = vadd.f32 %v2378_v3, %v182_v14  ;;  %v2755_v14 = vpop.xlane.xlu1 %2754 }
 0x6ca   :  { %3318 = vpow2.f32 %v3083_v51  ;;  %v3084_v5 = vmul.f32 -1.442695, %v2384_v57  ;;  %v2380_v6 = vpop.f32.mrf.mxu1  ;;  %v186_v50 = vadd.f32 %v3666_v52, %v132_v49 }
 0x6cb   :  { %v2340_v8 = vpop.f32.mrf.mxu0 }
 0x6cc   :  { %3320 = vpow2.f32 %v3084_v5  ;;  %v2381_v9 = vpop.f32.mrf.mxu1 }
 0x6cd   :  { %3322 = vpow2.f32 %v3085_v13  ;;  %v2757_v13 = vpop.xlane.xlu0 %2756 }
 0x6d7   :  { %v3319_v15 = vpop.eup %3318 }
 0x6d8   :  { %v2396_v17 = vadd.f32 1.0, %v3319_v15  ;;  %v2759_v15 = vpop.xlane.xlu0 %2758 }
 0x6d9   :  { %v3321_v18 = vpop.eup %3320 }
 0x6da   :  { %3324 = vrcp.f32 %v2396_v17  ;;  %v2397_v19 = vadd.f32 1.0, %v3321_v18  ;;  %v3323_v20 = vpop.eup %3322  ;;  %v2761_v17 = vpop.xlane.xlu1 %2760  ;;  %v2769_v18 = vstv %s4150_s5 }
 0x6db   :  { %3326 = vtanh.f32 %v2386_v16  ;;  %v2398_v28 = vadd.f32 1.0, %v3323_v20  ;;  %v2787_v16 = vand.u32 127, %v81_v38  ;;  %v2772_v20 = vadd.f32 %v2769_v18, %v2757_v13 }
 0x6dc   :  { %3328 = vrcp.f32 %v2397_v19  ;;  %v2771_v19 = vadd.f32 %v2769_v18, %v2755_v14 }
 0x6dd   :  { %3330 = vrcp.f32 %v2398_v28  ;;  %v2773_v28 = vadd.f32 %v2769_v18, %v2759_v15 }
 0x6e7   :  { %v3325_v21 = vpop.eup %3324 }
 0x6e8   :  { %v3327_v22 = vpop.eup %3326 }
 0x6e9   :  { %v3329_v23 = vpop.eup %3328  ;;  %v2407_v31 = vmul.f32 %v3327_v22, %v3325_v21  ;;  %v2763_v21 = vpop.xlane.xlu0 %2762  ;;  %v2790_v22 = vsub.s32 %v2787_v16, %v3633_v39 }
 0x6ea   :  { %v2406_v35 = vmul.f32 %v3329_v23, %v4081_v41  ;;  %v3331_v0 = vpop.eup %3330  ;;  %v2770_v23 = vadd.f32 %v2769_v18, %v2753_v12 }
 0x6ec   :  { %v2408_v30 = vadd.f32 %v2407_v31, %v2406_v35  ;;  %v2774_v31 = vadd.f32 %v2769_v18, %v2761_v17  ;;  %v2791_v38 = vrot.slane %v2770_v23, %v2790_v22 }
 0x6ee   :  { %3332 = vtanh.f32 %v2408_v30 }
 0x6fb   :  { %v3333_v61 = vpop.eup %3332 }
 0x6fc   :  { %v2410_v32 = vmul.f32 %v3333_v61, %v3331_v0  ;;  %v2775_v0 = vadd.f32 %v2769_v18, %v2763_v21  ;;  %v2799_v61 = vrot.slane %v2772_v20, %v2790_v22 }
 0x6fe   :  { %v2750_v24 = vmul.f32 %v3350_v36, %v2410_v32  ;;  %v2422_v58 = vpack.c.bf16 %v2410_v32, %v2410_v32  ;;  %v2811_v25 = vrot.slane %v2775_v0, %v2790_v22 }
 0x700   :  { %2764 = vadd.xlane.f32.xlu1 %v2750_v24  ;;  %2648 = vmatmul.mubr.bf16.vlgmr.msra.gmra.mxu0 %v2422_v58  ;;  %v2807_v24 = vrot.slane %v2774_v31, %v2790_v22 }
 0x701   :  { %2689 = vmatmul.mubr.bf16.vlgmr.msra.gmra.mxu1 %v2422_v58 }
 0x789   :  { %v2765_v35 = vpop.xlane.xlu1 %2764 }
 0x78a   :  { %v2776_v32 = vadd.f32 %v2769_v18, %v2765_v35 }
 0x78c   :  { %v2815_v39 = vrot.slane %v2776_v32, %v2790_v22 }
 0x7c0   :  { %v2649_v62 = vpop.f32.mrf.mxu0 }
 0x7c1   :  { %v2697_v46 = vadd.f32 %v2649_v62, %v183_v40  ;;  %v2690_v41 = vpop.f32.mrf.mxu1 }
 0x7c2   :  { %v2651_v63 = vpop.f32.mrf.mxu0  ;;  %v2699_v2 = vadd.f32 %v2690_v41, %v185_v48 }
 0x7c3   :  { %v3118_v29 = vmul.f32 -1.442695, %v2697_v46  ;;  %v2698_v26 = vadd.f32 %v2651_v63, %v184_v44  ;;  %v2692_v34 = vpop.f32.mrf.mxu1 }
 0x7c4   :  { %v2653_v1 = vpop.f32.mrf.mxu0  ;;  %v3120_v59 = vmul.f32 -1.442695, %v2699_v2  ;;  %v2700_v54 = vadd.f32 %v2692_v34, %v186_v50 }
 0x7c5   :  { %3334 = vpow2.f32 %v3118_v29  ;;  %v3119_v42 = vmul.f32 -1.442695, %v2698_v26  ;;  %v2694_v47 = vpop.f32.mrf.mxu1 }
 0x7c6   :  { %v2654_v43 = vpop.f32.mrf.mxu0 }
 0x7c7   :  { %3336 = vpow2.f32 %v3119_v42  ;;  %v2695_v45 = vpop.f32.mrf.mxu1 }
 0x7c8   :  { %3338 = vpow2.f32 %v3120_v59 }
 0x7d2   :  { %v3335_v53 = vpop.eup %3334 }
 0x7d3   :  { %v2710_v51 = vadd.f32 1.0, %v3335_v53 }
 0x7d4   :  { %v3337_v57 = vpop.eup %3336 }
 0x7d5   :  { %3340 = vrcp.f32 %v2710_v51  ;;  %v2711_v3 = vadd.f32 1.0, %v3337_v57  ;;  %v3339_v55 = vpop.eup %3338 }
 0x7d6   :  { %3342 = vtanh.f32 %v2700_v54  ;;  %v2712_v27 = vadd.f32 1.0, %v3339_v55 }
 0x7d7   :  { %3344 = vrcp.f32 %v2711_v3 }
 0x7d8   :  { %3346 = vrcp.f32 %v2712_v27 }
 0x7e2   :  { %v3341_v4 = vpop.eup %3340 }
 0x7e3   :  { %v3343_v5 = vpop.eup %3342 }
 0x7e4   :  { %v3345_v6 = vpop.eup %3344  ;;  %v2721_v8 = vmul.f32 %v3343_v5, %v3341_v4 }
 0x7e5   :  { %v2720_v7 = vmul.f32 %v3345_v6, %v2408_v30  ;;  %v3347_v52 = vpop.eup %3346  ;;  %v2795_v30 = vrot.slane %v2771_v19, %v2790_v22 }
 0x7e7   :  { %v2722_v37 = vadd.f32 %v2721_v8, %v2720_v7  ;;  %v2821_v58 = vsel %vm2820_vm0, %v2795_v30, %v2791_v38 }
 0x7e8   :  { %v2823_v56 = vsel %vm2822_vm1, %v2799_v61, %v2821_v58 }
 0x7e9   :  { %3348 = vtanh.f32 %v2722_v37 }
 0x7f6   :  { %v3349_v9 = vpop.eup %3348 }
 0x7f7   :  { %v2724_v10 = vmul.f32 %v3349_v9, %v3347_v52 }
 0x7f9   :  { %v2751_v11 = vmul.f32 %v3350_v36, %v2724_v10  ;;  %v2803_v36 = vrot.slane %v2773_v28, %v2790_v22 }
 0x7fb   :  { %2766 = vadd.xlane.f32.xlu0 %v2751_v11  ;;  %v2825_v40 = vsel %vm2824_vm2, %v2803_v36, %v2823_v56 }
 0x7fc   :  { %v2827_v46 = vsel %vm2826_vm3, %v2807_v24, %v2825_v40 }
 0x7fd   :  { %v2829_v41 = vsel %vm2828_vm4, %v2811_v25, %v2827_v46 }
 0x7fe   :  { %v2831_v63 = vsel %vm2830_vm5, %v2815_v39, %v2829_v41 }
 0x884   :  { %v2767_v60 = vpop.xlane.xlu0 %2766 }
 0x885   :  { %v2777_v62 = vadd.f32 %v2769_v18, %v2767_v60 }
 0x887   :  { %v2819_v44 = vrot.slane %v2777_v62, %v2790_v22 }
 0x889   :  { %v2833_v29 = vsel %vm2832_vm6, %v2819_v44, %v2831_v63 }
 0x88a   :  { %2836 = vst.msk [vmem:[%s4151_s6] sm:$0xff] %vm2835_vm7, %v2833_v29 }

</bundles_post_ra>
